<compile_context>
chip_gen: v6e
topology: v6e:2x2x1
jax: 0.10.0
libtpu: 0.0.40
codegen_flags: <defaults>
</compile_context>

<pallas_src>
import functools
import jax
import jax.numpy as jnp
from jax.experimental import pallas as pl
from jax.experimental.pallas import tpu as pltpu

# ----- small synthetic config (stands in for input_dim=768 / output_dim=512) -----
VOCAB = 64
MAX_POS = 16
HIDDEN = 128         # "input_dim" (lane-aligned stand-in for 768)
N_HEADS = 4
HEAD_DIM = HIDDEN // N_HEADS
FFN = 256            # stand-in for 3072
N_LAYERS = 2
OUT_DIM = 64         # "output_dim" (stand-in for 512)
NUM_LABEL = 7
OUT_PAD = 128        # lane-dense padded widths for the head kernels
CLF_PAD = 128
LN_EPS = 1e-12
ROW_TILE = 8         # sublane multiple for the CLS-head row padding


# ---------------- Pallas kernels ----------------

def _ln(x, g, b):
    mu = jnp.mean(x, axis=-1, keepdims=True)
    var = jnp.mean(jnp.square(x - mu), axis=-1, keepdims=True)
    return (x - mu) * jax.lax.rsqrt(var + LN_EPS) * g + b


def _encoder_kernel(x_ref, bias_ref, eg_ref, eb_ref,
                    wqkv_ref, bqkv_ref, wo_ref, bo_ref, g1_ref, b1_ref,
                    w1_ref, fb1_ref, w2_ref, fb2_ref, g2_ref, b2_ref,
                    o_ref, h_scratch):
    # grid = (batch, layer); layer axis is "arbitrary" -> h_scratch is the
    # per-sequence hidden-state carry that stays resident in VMEM.
    l = pl.program_id(1)
    H = HIDDEN

    # Layer 0: embedding LayerNorm of the raw embedding sum into the carry.
    @pl.when(l == 0)
    def _():
        h_scratch[...] = _ln(x_ref[0], eg_ref[...], eb_ref[...])

    x = h_scratch[...]                              # [S, H] f32 (residual)
    bias = bias_ref[0]                              # [1, S] additive key mask

    # ---- self-attention: fused QKV matmul (scale pre-folded into Wq) ----
    qkv = jnp.dot(x.astype(jnp.bfloat16), wqkv_ref[0],
                  preferred_element_type=jnp.float32) + bqkv_ref[0]      # [S, 3H]
    ctx_parts = []
    for h in range(N_HEADS):                        # static unroll, heads sliced in-VMEM
        q = qkv[:, h * HEAD_DIM:(h + 1) * HEAD_DIM]
        k = qkv[:, H + h * HEAD_DIM:H + (h + 1) * HEAD_DIM]
        v = qkv[:, 2 * H + h * HEAD_DIM:2 * H + (h + 1) * HEAD_DIM]
        s = jax.lax.dot_general(q.astype(jnp.bfloat16), k.astype(jnp.bfloat16),
                                (((1,), (1,)), ((), ())),
                                preferred_element_type=jnp.float32)      # [S, S]
        s = s + bias
        m = jnp.max(s, axis=-1, keepdims=True)
        p = jnp.exp(s - m)
        p = p * pl.reciprocal(jnp.sum(p, axis=-1, keepdims=True), approx=True)
        ctx_parts.append(jnp.dot(p.astype(jnp.bfloat16), v.astype(jnp.bfloat16),
                                 preferred_element_type=jnp.float32))    # [S, Dh]
    ctx = jnp.concatenate(ctx_parts, axis=-1)                            # [S, H]

    attn_out = jnp.dot(ctx.astype(jnp.bfloat16), wo_ref[0],
                       preferred_element_type=jnp.float32) + bo_ref[0]
    y = _ln(x + attn_out, g1_ref[0], b1_ref[0])

    # ---- feed-forward ----
    h1 = jnp.dot(y.astype(jnp.bfloat16), w1_ref[0],
                 preferred_element_type=jnp.float32) + fb1_ref[0]
    # TODO(synk): HF ELECTRA uses exact (erf) GELU; tanh approximation used here.
    h1 = jax.nn.gelu(h1)
    h2 = jnp.dot(h1.astype(jnp.bfloat16), w2_ref[0],
                 preferred_element_type=jnp.float32) + fb2_ref[0]
    out = _ln(y + h2, g2_ref[0], b2_ref[0])

    h_scratch[...] = out                            # carry to next layer

    @pl.when(l == pl.num_programs(1) - 1)
    def _():
        o_ref[0] = out                              # write back only once per batch row


def _proj_kernel(x_ref, w_ref, b_ref, o_ref):
    o_ref[...] = jnp.dot(x_ref[...].astype(jnp.bfloat16), w_ref[...],
                         preferred_element_type=jnp.float32) + b_ref[...]


def _proj_clf_kernel(x_ref, wp_ref, bp_ref, wc_ref, bc_ref, o_ref):
    p = jnp.dot(x_ref[...].astype(jnp.bfloat16), wp_ref[...],
                preferred_element_type=jnp.float32) + bp_ref[...]
    o_ref[...] = jnp.dot(p.astype(jnp.bfloat16), wc_ref[...],
                         preferred_element_type=jnp.float32) + bc_ref[...]


# ---------------- Pallas wrappers ----------------

def encoder_stack(emb, mask_bias, iparams):
    """Whole N-layer encoder (incl. embedding LayerNorm) in one pallas_call."""
    B, S, H = emb.shape
    lw = iparams['layers']
    L = lw['wqkv'].shape[0]
    H3 = 3 * H
    wmap = lambda b, l: (l, 0, 0)    # per-layer stacked weights
    bmap = lambda b, l: (b, 0, 0)    # per-batch activations / mask
    cmap = lambda b, l: (0, 0)       # constants (embedding LN params)
    return pl.pallas_call(
        _encoder_kernel,
        out_shape=jax.ShapeDtypeStruct((B, S, H), jnp.float32),
        grid=(B, L),
        in_specs=[
            pl.BlockSpec((1, S, H), bmap),          # embedding sum
            pl.BlockSpec((1, 1, S), bmap),          # additive attention mask bias
            pl.BlockSpec((1, H), cmap),             # emb LN gamma
            pl.BlockSpec((1, H), cmap),             # emb LN beta
            pl.BlockSpec((1, H, H3), wmap),         # wqkv (bf16)
            pl.BlockSpec((1, 1, H3), wmap),         # bqkv
            pl.BlockSpec((1, H, H), wmap),          # wo   (bf16)
            pl.BlockSpec((1, 1, H), wmap),          # bo
            pl.BlockSpec((1, 1, H), wmap),          # ln1 gamma
            pl.BlockSpec((1, 1, H), wmap),          # ln1 beta
            pl.BlockSpec((1, H, FFN), wmap),        # w1   (bf16)
            pl.BlockSpec((1, 1, FFN), wmap),        # b1
            pl.BlockSpec((1, FFN, H), wmap),        # w2   (bf16)
            pl.BlockSpec((1, 1, H), wmap),          # b2
            pl.BlockSpec((1, 1, H), wmap),          # ln2 gamma
            pl.BlockSpec((1, 1, H), wmap),          # ln2 beta
        ],
        out_specs=pl.BlockSpec((1, S, H), bmap),
        scratch_shapes=[pltpu.VMEM((S, H), jnp.float32)],
        compiler_params=pltpu.CompilerParams(
            dimension_semantics=("parallel", "arbitrary")),
    )(emb, mask_bias, iparams['emb_ln_g'], iparams['emb_ln_b'],
      lw['wqkv'], lw['bqkv'], lw['wo'], lw['bo'], lw['ln1_g'], lw['ln1_b'],
      lw['w1'], lw['b1'], lw['w2'], lw['b2'], lw['ln2_g'], lw['ln2_b'])


# ---------------- parameters ----------------

def init_params(key):
    def nrm(k, shape, scale=0.02):
        return scale * jax.random.normal(k, shape, jnp.float32)

    keys = iter(jax.random.split(key, 16 + 14 * N_LAYERS))
    params = {
        'word_emb': nrm(next(keys), (VOCAB, HIDDEN)),
        'pos_emb':  nrm(next(keys), (MAX_POS, HIDDEN)),
        'type_emb': nrm(next(keys), (2, HIDDEN)),
        'emb_ln_g': jnp.ones((HIDDEN,), jnp.float32),
        'emb_ln_b': jnp.zeros((HIDDEN,), jnp.float32),
        'proj_w': nrm(next(keys), (HIDDEN, OUT_DIM)),
        'proj_b': jnp.zeros((OUT_DIM,), jnp.float32),
        'clf_w':  nrm(next(keys), (OUT_DIM, NUM_LABEL)),
        'clf_b':  jnp.zeros((NUM_LABEL,), jnp.float32),
        'layers': [],
    }
    for _ in range(N_LAYERS):
        params['layers'].append({
            'wq': nrm(next(keys), (HIDDEN, HIDDEN)), 'bq': jnp.zeros((HIDDEN,), jnp.float32),
            'wk': nrm(next(keys), (HIDDEN, HIDDEN)), 'bk': jnp.zeros((HIDDEN,), jnp.float32),
            'wv': nrm(next(keys), (HIDDEN, HIDDEN)), 'bv': jnp.zeros((HIDDEN,), jnp.float32),
            'wo': nrm(next(keys), (HIDDEN, HIDDEN)), 'bo': jnp.zeros((HIDDEN,), jnp.float32),
            'ln1_g': jnp.ones((HIDDEN,), jnp.float32), 'ln1_b': jnp.zeros((HIDDEN,), jnp.float32),
            'w1': nrm(next(keys), (HIDDEN, FFN)), 'b1': jnp.zeros((FFN,), jnp.float32),
            'w2': nrm(next(keys), (FFN, HIDDEN)), 'b2': jnp.zeros((HIDDEN,), jnp.float32),
            'ln2_g': jnp.ones((HIDDEN,), jnp.float32), 'ln2_b': jnp.zeros((HIDDEN,), jnp.float32),
        })
    return params


def prepare_inference_params(params):
    """Fuse QKV, fold 1/sqrt(Dh) into Q, cast matmul weights to bf16, stack
    per-layer weights along a leading L axis, lane-pad the head weights."""
    scale = 1.0 / (HEAD_DIM ** 0.5)

    def stack(fn):
        return jnp.stack([fn(lp) for lp in params['layers']], axis=0)

    layers = {
        'wqkv': stack(lambda lp: jnp.concatenate(
            [lp['wq'] * scale, lp['wk'], lp['wv']], axis=1).astype(jnp.bfloat16)),
        'bqkv': stack(lambda lp: jnp.concatenate(
            [lp['bq'] * scale, lp['bk'], lp['bv']], axis=0).reshape(1, 3 * HIDDEN)),
        'wo': stack(lambda lp: lp['wo'].astype(jnp.bfloat16)),
        'bo': stack(lambda lp: lp['bo'].reshape(1, HIDDEN)),
        'ln1_g': stack(lambda lp: lp['ln1_g'].reshape(1, HIDDEN)),
        'ln1_b': stack(lambda lp: lp['ln1_b'].reshape(1, HIDDEN)),
        'w1': stack(lambda lp: lp['w1'].astype(jnp.bfloat16)),
        'b1': stack(lambda lp: lp['b1'].reshape(1, FFN)),
        'w2': stack(lambda lp: lp['w2'].astype(jnp.bfloat16)),
        'b2': stack(lambda lp: lp['b2'].reshape(1, HIDDEN)),
        'ln2_g': stack(lambda lp: lp['ln2_g'].reshape(1, HIDDEN)),
        'ln2_b': stack(lambda lp: lp['ln2_b'].reshape(1, HIDDEN)),
    }
    proj_w = jnp.zeros((HIDDEN, OUT_PAD), jnp.float32).at[:, :OUT_DIM].set(params['proj_w'])
    proj_b = jnp.zeros((1, OUT_PAD), jnp.float32).at[:, :OUT_DIM].set(params['proj_b'])
    clf_w = jnp.zeros((OUT_PAD, CLF_PAD), jnp.float32).at[:OUT_DIM, :NUM_LABEL].set(params['clf_w'])
    clf_b = jnp.zeros((1, CLF_PAD), jnp.float32).at[:, :NUM_LABEL].set(params['clf_b'])
    return {
        'word_emb': params['word_emb'],
        'pos_emb': params['pos_emb'],
        'type_emb': params['type_emb'],
        'emb_ln_g': params['emb_ln_g'].reshape(1, HIDDEN),
        'emb_ln_b': params['emb_ln_b'].reshape(1, HIDDEN),
        'layers': layers,
        'proj_w': proj_w.astype(jnp.bfloat16),
        'proj_b': proj_b,
        'clf_w': clf_w.astype(jnp.bfloat16),
        'clf_b': clf_b,
    }


# ---------------- forward (mirrors TextEncoder.forward) ----------------

@functools.partial(jax.jit, static_argnames=('return_hidden_states', 'do_clf'))
def text_encoder_forward(iparams, input_ids, attention_mask,
                         return_hidden_states=False, do_clf=False):
    B, S = input_ids.shape

    # embeddings (gather is XLA glue); LayerNorm happens inside the encoder kernel
    emb = (iparams['word_emb'][input_ids]
           + iparams['pos_emb'][None, :S, :]
           + iparams['type_emb'][0][None, None, :])
    # BERT/ELECTRA-style additive attention mask bias
    mask_bias = ((1.0 - attention_mask.astype(jnp.float32)) * -1e4).reshape(B, 1, S)

    h = encoder_stack(emb, mask_bias, iparams)      # one kernel for all layers

    if return_hidden_states:
        return h                                    # last_hidden_state [B, S, H]

    cls_vec = h[:, 0, :]                            # CLS token [B, H]
    MP = ((B + ROW_TILE - 1) // ROW_TILE) * ROW_TILE
    x = jnp.zeros((MP, HIDDEN), jnp.float32).at[:B].set(cls_vec)

    if do_clf:
        out = pl.pallas_call(
            _proj_clf_kernel,
            out_shape=jax.ShapeDtypeStruct((MP, CLF_PAD), jnp.float32),
            grid=(1,),
            in_specs=[pl.BlockSpec((MP, HIDDEN), lambda i: (0, 0)),
                      pl.BlockSpec((HIDDEN, OUT_PAD), lambda i: (0, 0)),
                      pl.BlockSpec((1, OUT_PAD), lambda i: (0, 0)),
                      pl.BlockSpec((OUT_PAD, CLF_PAD), lambda i: (0, 0)),
                      pl.BlockSpec((1, CLF_PAD), lambda i: (0, 0))],
            out_specs=pl.BlockSpec((MP, CLF_PAD), lambda i: (0, 0)),
        )(x, iparams['proj_w'], iparams['proj_b'], iparams['clf_w'], iparams['clf_b'])
        return out[:B, :NUM_LABEL]

    out = pl.pallas_call(
        _proj_kernel,
        out_shape=jax.ShapeDtypeStruct((MP, OUT_PAD), jnp.float32),
        grid=(1,),
        in_specs=[pl.BlockSpec((MP, HIDDEN), lambda i: (0, 0)),
                  pl.BlockSpec((HIDDEN, OUT_PAD), lambda i: (0, 0)),
                  pl.BlockSpec((1, OUT_PAD), lambda i: (0, 0))],
        out_specs=pl.BlockSpec((MP, OUT_PAD), lambda i: (0, 0)),
    )(x, iparams['proj_w'], iparams['proj_b'])
    return out[:B, :OUT_DIM]


if __name__ == "__main__":
    key = jax.random.PRNGKey(0)
    pkey, ikey = jax.random.split(key)
    params = init_params(pkey)
    iparams = prepare_inference_params(params)

    B, S = 2, 8
    input_ids = jax.random.randint(ikey, (B, S), 0, VOCAB, dtype=jnp.int32)
    attention_mask = jnp.array([[1, 1, 1, 1, 1, 1, 0, 0],
                                [1, 1, 1, 1, 0, 0, 0, 0]], dtype=jnp.int32)

    proj = text_encoder_forward(iparams, input_ids, attention_mask)
    logits = text_encoder_forward(iparams, input_ids, attention_mask, do_clf=True)
    hidden = text_encoder_forward(iparams, input_ids, attention_mask,
                                  return_hidden_states=True)

    jax.block_until_ready((proj, logits, hidden))
    assert proj.shape == (B, OUT_DIM)
    assert logits.shape == (B, NUM_LABEL)
    assert hidden.shape == (B, S, HIDDEN)
    assert bool(jnp.all(jnp.isfinite(proj))) and bool(jnp.all(jnp.isfinite(logits)))
    print("KERNEL_OK")
</pallas_src>

<mosaic_0001>
module attributes {stable_mosaic.version = 11 : i64} {
  func.func @_proj_kernel(%arg0: i32, %arg1: memref<8x128xf32, #tpu.memory_space<vmem>>, %arg2: memref<128x128xbf16, #tpu.memory_space<vmem>>, %arg3: memref<1x128xf32, #tpu.memory_space<vmem>>, %arg4: memref<8x128xf32, #tpu.memory_space<vmem>>) attributes {dimension_semantics = [#tpu.dimension_semantics<arbitrary>], iteration_bounds = array<i64: 1>, scalar_prefetch = 0 : i64, scratch_operands = 0 : i64, tpu.core_type = #tpu.core_type<tc>, window_params = [{pipeline_mode = #tpu.pipeline_mode<synchronous>, transform_indices = @transform_0, window_bounds = array<i64: 8, 128>}, {pipeline_mode = #tpu.pipeline_mode<synchronous>, transform_indices = @transform_1, window_bounds = array<i64: 128, 128>}, {pipeline_mode = #tpu.pipeline_mode<synchronous>, transform_indices = @transform_2, window_bounds = array<i64: 1, 128>}, {pipeline_mode = #tpu.pipeline_mode<synchronous>, transform_indices = @transform_3, window_bounds = array<i64: 8, 128>}]} {
    %c0 = arith.constant 0 : index
    %c0_0 = arith.constant 0 : index
    %0 = vector.load %arg1[%c0, %c0_0] : memref<8x128xf32, #tpu.memory_space<vmem>>, vector<8x128xf32>
    %1 = arith.truncf %0 : vector<8x128xf32> to vector<8x128xbf16>
    %c0_1 = arith.constant 0 : index
    %c0_2 = arith.constant 0 : index
    %2 = vector.load %arg2[%c0_1, %c0_2] : memref<128x128xbf16, #tpu.memory_space<vmem>>, vector<128x128xbf16>
    %cst = arith.constant dense<0.000000e+00> : vector<8x128xf32>
    %3 = tpu.matmul %1, %2, %cst {dimension_numbers = #tpu.dot_dimension_numbers<[1], [0], [0], [1], [0, 0, 1, 1], [], []>} : vector<8x128xbf16>, vector<128x128xbf16>, vector<8x128xf32> -> vector<8x128xf32>
    %c0_3 = arith.constant 0 : index
    %c0_4 = arith.constant 0 : index
    %4 = vector.load %arg3[%c0_3, %c0_4] : memref<1x128xf32, #tpu.memory_space<vmem>>, vector<1x128xf32>
    %5 = vector.broadcast %4 : vector<1x128xf32> to vector<8x128xf32>
    %6 = arith.addf %3, %5 : vector<8x128xf32>
    %c0_5 = arith.constant 0 : index
    %c0_6 = arith.constant 0 : index
    %7 = vector.load %arg4[%c0_5, %c0_6] : memref<8x128xf32, #tpu.memory_space<vmem>>, vector<8x128xf32>
    tpu.vector_store %arg4[%c0_5, %c0_6], %6 {strides = array<i32>} : memref<8x128xf32, #tpu.memory_space<vmem>>, vector<8x128xf32>,
    return
  }
  func.func @transform_0(%arg0: i32) -> (i32, i32) {
    %c0_i32 = arith.constant 0 : i32
    %c0_i32_0 = arith.constant 0 : i32
    %c0_i32_1 = arith.constant 0 : i32
    return %c0_i32, %c0_i32_0 : i32, i32
  }
  func.func @transform_1(%arg0: i32) -> (i32, i32) {
    %c0_i32 = arith.constant 0 : i32
    %c0_i32_0 = arith.constant 0 : i32
    %c0_i32_1 = arith.constant 0 : i32
    return %c0_i32, %c0_i32_0 : i32, i32
  }
  func.func @transform_2(%arg0: i32) -> (i32, i32) {
    %c0_i32 = arith.constant 0 : i32
    %c0_i32_0 = arith.constant 0 : i32
    %c0_i32_1 = arith.constant 0 : i32
    return %c0_i32, %c0_i32_0 : i32, i32
  }
  func.func @transform_3(%arg0: i32) -> (i32, i32) {
    %c0_i32 = arith.constant 0 : i32
    %c0_i32_0 = arith.constant 0 : i32
    %c0_i32_1 = arith.constant 0 : i32
    return %c0_i32, %c0_i32_0 : i32, i32
  }
}

module attributes {stable_mosaic.version = 11 : i64} {
  func.func @_encoder_kernel(%arg0: i32, %arg1: i32, %arg2: memref<1x8x128xf32, #tpu.memory_space<vmem>>, %arg3: memref<1x1x8xf32, #tpu.memory_space<vmem>>, %arg4: memref<1x128xf32, #tpu.memory_space<vmem>>, %arg5: memref<1x128xf32, #tpu.memory_space<vmem>>, %arg6: memref<1x128x384xbf16, #tpu.memory_space<vmem>>, %arg7: memref<1x1x384xf32, #tpu.memory_space<vmem>>, %arg8: memref<1x128x128xbf16, #tpu.memory_space<vmem>>, %arg9: memref<1x1x128xf32, #tpu.memory_space<vmem>>, %arg10: memref<1x1x128xf32, #tpu.memory_space<vmem>>, %arg11: memref<1x1x128xf32, #tpu.memory_space<vmem>>, %arg12: memref<1x128x256xbf16, #tpu.memory_space<vmem>>, %arg13: memref<1x1x256xf32, #tpu.memory_space<vmem>>, %arg14: memref<1x256x128xbf16, #tpu.memory_space<vmem>>, %arg15: memref<1x1x128xf32, #tpu.memory_space<vmem>>, %arg16: memref<1x1x128xf32, #tpu.memory_space<vmem>>, %arg17: memref<1x1x128xf32, #tpu.memory_space<vmem>>, %arg18: memref<1x8x128xf32, #tpu.memory_space<vmem>>, %arg19: memref<8x128xf32, #tpu.memory_space<vmem>>) attributes {dimension_semantics = [#tpu.dimension_semantics<parallel>, #tpu.dimension_semantics<arbitrary>], iteration_bounds = array<i64: 2, 2>, scalar_prefetch = 0 : i64, scratch_operands = 1 : i64, tpu.core_type = #tpu.core_type<tc>, window_params = [{transform_indices = @transform_0, window_bounds = array<i64: 1, 8, 128>}, {transform_indices = @transform_1, window_bounds = array<i64: 1, 1, 8>}, {pipeline_mode = #tpu.pipeline_mode<synchronous>, transform_indices = @transform_2, window_bounds = array<i64: 1, 128>}, {pipeline_mode = #tpu.pipeline_mode<synchronous>, transform_indices = @transform_3, window_bounds = array<i64: 1, 128>}, {transform_indices = @transform_4, window_bounds = array<i64: 1, 128, 384>}, {transform_indices = @transform_5, window_bounds = array<i64: 1, 1, 384>}, {transform_indices = @transform_6, window_bounds = array<i64: 1, 128, 128>}, {transform_indices = @transform_7, window_bounds = array<i64: 1, 1, 128>}, {transform_indices = @transform_8, window_bounds = array<i64: 1, 1, 128>}, {transform_indices = @transform_9, window_bounds = array<i64: 1, 1, 128>}, {transform_indices = @transform_10, window_bounds = array<i64: 1, 128, 256>}, {transform_indices = @transform_11, window_bounds = array<i64: 1, 1, 256>}, {transform_indices = @transform_12, window_bounds = array<i64: 1, 256, 128>}, {transform_indices = @transform_13, window_bounds = array<i64: 1, 1, 128>}, {transform_indices = @transform_14, window_bounds = array<i64: 1, 1, 128>}, {transform_indices = @transform_15, window_bounds = array<i64: 1, 1, 128>}, {transform_indices = @transform_16, window_bounds = array<i64: 1, 8, 128>}]} {
    %c0_i32 = arith.constant 0 : i32
    %0 = arith.cmpi eq, %arg1, %c0_i32 : i32
    %1 = arith.extui %0 : i1 to i32
    %c0_i32_0 = arith.constant 0 : i32
    %2 = arith.cmpi ne, %1, %c0_i32_0 : i32
    scf.if %2 {
      %c0_77 = arith.constant 0 : index
      %c0_78 = arith.constant 0 : index
      %c0_79 = arith.constant 0 : index
      %194 = vector.load %arg2[%c0_77, %c0_78, %c0_79] : memref<1x8x128xf32, #tpu.memory_space<vmem>>, vector<1x8x128xf32>
      %195 = vector.shape_cast %194 : vector<1x8x128xf32> to vector<8x128xf32>
      %c0_80 = arith.constant 0 : index
      %c0_81 = arith.constant 0 : index
      %196 = vector.load %arg4[%c0_80, %c0_81] : memref<1x128xf32, #tpu.memory_space<vmem>>, vector<1x128xf32>
      %c0_82 = arith.constant 0 : index
      %c0_83 = arith.constant 0 : index
      %197 = vector.load %arg5[%c0_82, %c0_83] : memref<1x128xf32, #tpu.memory_space<vmem>>, vector<1x128xf32>
      %cst_84 = arith.constant dense<0.000000e+00> : vector<8xf32>
      %198 = vector.multi_reduction <add>, %195, %cst_84 [1] : vector<8x128xf32> to vector<8xf32>
      %199 = vector.shape_cast %198 : vector<8xf32> to vector<8x1xf32>
      %cst_85 = arith.constant 1.280000e+02 : f32
      %200 = vector.broadcast %cst_85 : f32 to vector<8x1xf32>
      %201 = arith.divf %199, %200 : vector<8x1xf32>
      %202 = vector.broadcast %201 : vector<8x1xf32> to vector<8x128xf32>
      %203 = arith.subf %195, %202 : vector<8x128xf32>
      %204 = arith.mulf %203, %203 : vector<8x128xf32>
      %cst_86 = arith.constant dense<0.000000e+00> : vector<8xf32>
      %205 = vector.multi_reduction <add>, %204, %cst_86 [1] : vector<8x128xf32> to vector<8xf32>
      %206 = vector.shape_cast %205 : vector<8xf32> to vector<8x1xf32>
      %cst_87 = arith.constant 1.280000e+02 : f32
      %207 = vector.broadcast %cst_87 : f32 to vector<8x1xf32>
      %208 = arith.divf %206, %207 : vector<8x1xf32>
      %209 = vector.broadcast %201 : vector<8x1xf32> to vector<8x128xf32>
      %210 = arith.subf %195, %209 : vector<8x128xf32>
      %cst_88 = arith.constant 9.99999996E-13 : f32
      %211 = vector.broadcast %cst_88 : f32 to vector<8x1xf32>
      %212 = arith.addf %208, %211 : vector<8x1xf32>
      %213 = math.rsqrt %212 : vector<8x1xf32>
      %214 = vector.broadcast %213 : vector<8x1xf32> to vector<8x128xf32>
      %215 = arith.mulf %210, %214 : vector<8x128xf32>
      %216 = vector.broadcast %196 : vector<1x128xf32> to vector<8x128xf32>
      %217 = arith.mulf %215, %216 : vector<8x128xf32>
      %218 = vector.broadcast %197 : vector<1x128xf32> to vector<8x128xf32>
      %219 = arith.addf %217, %218 : vector<8x128xf32>
      %c0_89 = arith.constant 0 : index
      %c0_90 = arith.constant 0 : index
      %220 = vector.load %arg19[%c0_89, %c0_90] : memref<8x128xf32, #tpu.memory_space<vmem>>, vector<8x128xf32>
      tpu.vector_store %arg19[%c0_89, %c0_90], %219 {strides = array<i32>} : memref<8x128xf32, #tpu.memory_space<vmem>>, vector<8x128xf32>,
    } else {
    }
    %c0 = arith.constant 0 : index
    %c0_1 = arith.constant 0 : index
    %3 = vector.load %arg19[%c0, %c0_1] : memref<8x128xf32, #tpu.memory_space<vmem>>, vector<8x128xf32>
    %c0_2 = arith.constant 0 : index
    %c0_3 = arith.constant 0 : index
    %c0_4 = arith.constant 0 : index
    %4 = vector.load %arg3[%c0_2, %c0_3, %c0_4] : memref<1x1x8xf32, #tpu.memory_space<vmem>>, vector<1x1x8xf32>
    %5 = vector.shape_cast %4 : vector<1x1x8xf32> to vector<1x8xf32>
    %6 = arith.truncf %3 : vector<8x128xf32> to vector<8x128xbf16>
    %c0_5 = arith.constant 0 : index
    %c0_6 = arith.constant 0 : index
    %c0_7 = arith.constant 0 : index
    %7 = vector.load %arg6[%c0_5, %c0_6, %c0_7] : memref<1x128x384xbf16, #tpu.memory_space<vmem>>, vector<1x128x384xbf16>
    %8 = vector.shape_cast %7 : vector<1x128x384xbf16> to vector<128x384xbf16>
    %cst = arith.constant dense<0.000000e+00> : vector<8x384xf32>
    %9 = tpu.matmul %6, %8, %cst {dimension_numbers = #tpu.dot_dimension_numbers<[1], [0], [0], [1], [0, 0, 1, 1], [], []>} : vector<8x128xbf16>, vector<128x384xbf16>, vector<8x384xf32> -> vector<8x384xf32>
    %c0_8 = arith.constant 0 : index
    %c0_9 = arith.constant 0 : index
    %c0_10 = arith.constant 0 : index
    %10 = vector.load %arg7[%c0_8, %c0_9, %c0_10] : memref<1x1x384xf32, #tpu.memory_space<vmem>>, vector<1x1x384xf32>
    %11 = vector.shape_cast %10 : vector<1x1x384xf32> to vector<1x384xf32>
    %12 = vector.broadcast %11 : vector<1x384xf32> to vector<8x384xf32>
    %13 = arith.addf %9, %12 : vector<8x384xf32>
    %14 = vector.extract_strided_slice %13 {offsets = [0, 0], sizes = [8, 32], strides = [1, 1]} : vector<8x384xf32> to vector<8x32xf32>
    %15 = vector.extract_strided_slice %13 {offsets = [0, 128], sizes = [8, 32], strides = [1, 1]} : vector<8x384xf32> to vector<8x32xf32>
    %16 = vector.extract_strided_slice %13 {offsets = [0, 256], sizes = [8, 32], strides = [1, 1]} : vector<8x384xf32> to vector<8x32xf32>
    %17 = arith.truncf %14 : vector<8x32xf32> to vector<8x32xbf16>
    %18 = arith.truncf %15 : vector<8x32xf32> to vector<8x32xbf16>
    %cst_11 = arith.constant dense<0.000000e+00> : vector<8x8xf32>
    %19 = tpu.matmul %17, %18, %cst_11 {dimension_numbers = #tpu.dot_dimension_numbers<[1], [1], [0], [0], [0, 0, 1, 0], [], []>} : vector<8x32xbf16>, vector<8x32xbf16>, vector<8x8xf32> -> vector<8x8xf32>
    %20 = vector.broadcast %5 : vector<1x8xf32> to vector<8x8xf32>
    %21 = arith.addf %19, %20 : vector<8x8xf32>
    %cst_12 = arith.constant dense<0xFF800000> : vector<8xf32>
    %22 = vector.multi_reduction <maximumf>, %21, %cst_12 [1] : vector<8x8xf32> to vector<8xf32>
    %23 = vector.shape_cast %22 : vector<8xf32> to vector<8x1xf32>
    %24 = vector.broadcast %23 : vector<8x1xf32> to vector<8x8xf32>
    %25 = arith.subf %21, %24 : vector<8x8xf32>
    %26 = math.exp %25 : vector<8x8xf32>
    %cst_13 = arith.constant dense<0.000000e+00> : vector<8xf32>
    %27 = vector.multi_reduction <add>, %26, %cst_13 [1] : vector<8x8xf32> to vector<8xf32>
    %28 = vector.shape_cast %27 : vector<8xf32> to vector<8x1xf32>
    %29 = tpu.reciprocal %28 {approx = true} : vector<8x1xf32> -> vector<8x1xf32>
    %30 = vector.broadcast %29 : vector<8x1xf32> to vector<8x8xf32>
    %31 = arith.mulf %26, %30 : vector<8x8xf32>
    %32 = arith.truncf %31 : vector<8x8xf32> to vector<8x8xbf16>
    %33 = arith.truncf %16 : vector<8x32xf32> to vector<8x32xbf16>
    %cst_14 = arith.constant dense<0.000000e+00> : vector<8x32xf32>
    %34 = tpu.matmul %32, %33, %cst_14 {dimension_numbers = #tpu.dot_dimension_numbers<[1], [0], [0], [1], [0, 0, 1, 1], [], []>} : vector<8x8xbf16>, vector<8x32xbf16>, vector<8x32xf32> -> vector<8x32xf32>
    %35 = vector.extract_strided_slice %13 {offsets = [0, 32], sizes = [8, 32], strides = [1, 1]} : vector<8x384xf32> to vector<8x32xf32>
    %36 = vector.extract_strided_slice %13 {offsets = [0, 160], sizes = [8, 32], strides = [1, 1]} : vector<8x384xf32> to vector<8x32xf32>
    %37 = vector.extract_strided_slice %13 {offsets = [0, 288], sizes = [8, 32], strides = [1, 1]} : vector<8x384xf32> to vector<8x32xf32>
    %38 = arith.truncf %35 : vector<8x32xf32> to vector<8x32xbf16>
    %39 = arith.truncf %36 : vector<8x32xf32> to vector<8x32xbf16>
    %cst_15 = arith.constant dense<0.000000e+00> : vector<8x8xf32>
    %40 = tpu.matmul %38, %39, %cst_15 {dimension_numbers = #tpu.dot_dimension_numbers<[1], [1], [0], [0], [0, 0, 1, 0], [], []>} : vector<8x32xbf16>, vector<8x32xbf16>, vector<8x8xf32> -> vector<8x8xf32>
    %41 = vector.broadcast %5 : vector<1x8xf32> to vector<8x8xf32>
    %42 = arith.addf %40, %41 : vector<8x8xf32>
    %cst_16 = arith.constant dense<0xFF800000> : vector<8xf32>
    %43 = vector.multi_reduction <maximumf>, %42, %cst_16 [1] : vector<8x8xf32> to vector<8xf32>
    %44 = vector.shape_cast %43 : vector<8xf32> to vector<8x1xf32>
    %45 = vector.broadcast %44 : vector<8x1xf32> to vector<8x8xf32>
    %46 = arith.subf %42, %45 : vector<8x8xf32>
    %47 = math.exp %46 : vector<8x8xf32>
    %cst_17 = arith.constant dense<0.000000e+00> : vector<8xf32>
    %48 = vector.multi_reduction <add>, %47, %cst_17 [1] : vector<8x8xf32> to vector<8xf32>
    %49 = vector.shape_cast %48 : vector<8xf32> to vector<8x1xf32>
    %50 = tpu.reciprocal %49 {approx = true} : vector<8x1xf32> -> vector<8x1xf32>
    %51 = vector.broadcast %50 : vector<8x1xf32> to vector<8x8xf32>
    %52 = arith.mulf %47, %51 : vector<8x8xf32>
    %53 = arith.truncf %52 : vector<8x8xf32> to vector<8x8xbf16>
    %54 = arith.truncf %37 : vector<8x32xf32> to vector<8x32xbf16>
    %cst_18 = arith.constant dense<0.000000e+00> : vector<8x32xf32>
    %55 = tpu.matmul %53, %54, %cst_18 {dimension_numbers = #tpu.dot_dimension_numbers<[1], [0], [0], [1], [0, 0, 1, 1], [], []>} : vector<8x8xbf16>, vector<8x32xbf16>, vector<8x32xf32> -> vector<8x32xf32>
    %56 = vector.extract_strided_slice %13 {offsets = [0, 64], sizes = [8, 32], strides = [1, 1]} : vector<8x384xf32> to vector<8x32xf32>
    %57 = vector.extract_strided_slice %13 {offsets = [0, 192], sizes = [8, 32], strides = [1, 1]} : vector<8x384xf32> to vector<8x32xf32>
    %58 = vector.extract_strided_slice %13 {offsets = [0, 320], sizes = [8, 32], strides = [1, 1]} : vector<8x384xf32> to vector<8x32xf32>
    %59 = arith.truncf %56 : vector<8x32xf32> to vector<8x32xbf16>
    %60 = arith.truncf %57 : vector<8x32xf32> to vector<8x32xbf16>
    %cst_19 = arith.constant dense<0.000000e+00> : vector<8x8xf32>
    %61 = tpu.matmul %59, %60, %cst_19 {dimension_numbers = #tpu.dot_dimension_numbers<[1], [1], [0], [0], [0, 0, 1, 0], [], []>} : vector<8x32xbf16>, vector<8x32xbf16>, vector<8x8xf32> -> vector<8x8xf32>
    %62 = vector.broadcast %5 : vector<1x8xf32> to vector<8x8xf32>
    %63 = arith.addf %61, %62 : vector<8x8xf32>
    %cst_20 = arith.constant dense<0xFF800000> : vector<8xf32>
    %64 = vector.multi_reduction <maximumf>, %63, %cst_20 [1] : vector<8x8xf32> to vector<8xf32>
    %65 = vector.shape_cast %64 : vector<8xf32> to vector<8x1xf32>
    %66 = vector.broadcast %65 : vector<8x1xf32> to vector<8x8xf32>
    %67 = arith.subf %63, %66 : vector<8x8xf32>
    %68 = math.exp %67 : vector<8x8xf32>
    %cst_21 = arith.constant dense<0.000000e+00> : vector<8xf32>
    %69 = vector.multi_reduction <add>, %68, %cst_21 [1] : vector<8x8xf32> to vector<8xf32>
    %70 = vector.shape_cast %69 : vector<8xf32> to vector<8x1xf32>
    %71 = tpu.reciprocal %70 {approx = true} : vector<8x1xf32> -> vector<8x1xf32>
    %72 = vector.broadcast %71 : vector<8x1xf32> to vector<8x8xf32>
    %73 = arith.mulf %68, %72 : vector<8x8xf32>
    %74 = arith.truncf %73 : vector<8x8xf32> to vector<8x8xbf16>
    %75 = arith.truncf %58 : vector<8x32xf32> to vector<8x32xbf16>
    %cst_22 = arith.constant dense<0.000000e+00> : vector<8x32xf32>
    %76 = tpu.matmul %74, %75, %cst_22 {dimension_numbers = #tpu.dot_dimension_numbers<[1], [0], [0], [1], [0, 0, 1, 1], [], []>} : vector<8x8xbf16>, vector<8x32xbf16>, vector<8x32xf32> -> vector<8x32xf32>
    %77 = vector.extract_strided_slice %13 {offsets = [0, 96], sizes = [8, 32], strides = [1, 1]} : vector<8x384xf32> to vector<8x32xf32>
    %78 = vector.extract_strided_slice %13 {offsets = [0, 224], sizes = [8, 32], strides = [1, 1]} : vector<8x384xf32> to vector<8x32xf32>
    %79 = vector.extract_strided_slice %13 {offsets = [0, 352], sizes = [8, 32], strides = [1, 1]} : vector<8x384xf32> to vector<8x32xf32>
    %80 = arith.truncf %77 : vector<8x32xf32> to vector<8x32xbf16>
    %81 = arith.truncf %78 : vector<8x32xf32> to vector<8x32xbf16>
    %cst_23 = arith.constant dense<0.000000e+00> : vector<8x8xf32>
    %82 = tpu.matmul %80, %81, %cst_23 {dimension_numbers = #tpu.dot_dimension_numbers<[1], [1], [0], [0], [0, 0, 1, 0], [], []>} : vector<8x32xbf16>, vector<8x32xbf16>, vector<8x8xf32> -> vector<8x8xf32>
    %83 = vector.broadcast %5 : vector<1x8xf32> to vector<8x8xf32>
    %84 = arith.addf %82, %83 : vector<8x8xf32>
    %cst_24 = arith.constant dense<0xFF800000> : vector<8xf32>
    %85 = vector.multi_reduction <maximumf>, %84, %cst_24 [1] : vector<8x8xf32> to vector<8xf32>
    %86 = vector.shape_cast %85 : vector<8xf32> to vector<8x1xf32>
    %87 = vector.broadcast %86 : vector<8x1xf32> to vector<8x8xf32>
    %88 = arith.subf %84, %87 : vector<8x8xf32>
    %89 = math.exp %88 : vector<8x8xf32>
    %cst_25 = arith.constant dense<0.000000e+00> : vector<8xf32>
    %90 = vector.multi_reduction <add>, %89, %cst_25 [1] : vector<8x8xf32> to vector<8xf32>
    %91 = vector.shape_cast %90 : vector<8xf32> to vector<8x1xf32>
    %92 = tpu.reciprocal %91 {approx = true} : vector<8x1xf32> -> vector<8x1xf32>
    %93 = vector.broadcast %92 : vector<8x1xf32> to vector<8x8xf32>
    %94 = arith.mulf %89, %93 : vector<8x8xf32>
    %95 = arith.truncf %94 : vector<8x8xf32> to vector<8x8xbf16>
    %96 = arith.truncf %79 : vector<8x32xf32> to vector<8x32xbf16>
    %cst_26 = arith.constant dense<0.000000e+00> : vector<8x32xf32>
    %97 = tpu.matmul %95, %96, %cst_26 {dimension_numbers = #tpu.dot_dimension_numbers<[1], [0], [0], [1], [0, 0, 1, 1], [], []>} : vector<8x8xbf16>, vector<8x32xbf16>, vector<8x32xf32> -> vector<8x32xf32>
    %98 = tpu.concatenate %34, %55, %76, %97 in 1 : vector<8x32xf32>, vector<8x32xf32>, vector<8x32xf32>, vector<8x32xf32> -> vector<8x128xf32>
    %99 = arith.truncf %98 : vector<8x128xf32> to vector<8x128xbf16>
    %c0_27 = arith.constant 0 : index
    %c0_28 = arith.constant 0 : index
    %c0_29 = arith.constant 0 : index
    %100 = vector.load %arg8[%c0_27, %c0_28, %c0_29] : memref<1x128x128xbf16, #tpu.memory_space<vmem>>, vector<1x128x128xbf16>
    %101 = vector.shape_cast %100 : vector<1x128x128xbf16> to vector<128x128xbf16>
    %cst_30 = arith.constant dense<0.000000e+00> : vector<8x128xf32>
    %102 = tpu.matmul %99, %101, %cst_30 {dimension_numbers = #tpu.dot_dimension_numbers<[1], [0], [0], [1], [0, 0, 1, 1], [], []>} : vector<8x128xbf16>, vector<128x128xbf16>, vector<8x128xf32> -> vector<8x128xf32>
    %c0_31 = arith.constant 0 : index
    %c0_32 = arith.constant 0 : index
    %c0_33 = arith.constant 0 : index
    %103 = vector.load %arg9[%c0_31, %c0_32, %c0_33] : memref<1x1x128xf32, #tpu.memory_space<vmem>>, vector<1x1x128xf32>
    %104 = vector.shape_cast %103 : vector<1x1x128xf32> to vector<1x128xf32>
    %105 = vector.broadcast %104 : vector<1x128xf32> to vector<8x128xf32>
    %106 = arith.addf %102, %105 : vector<8x128xf32>
    %107 = arith.addf %3, %106 : vector<8x128xf32>
    %c0_34 = arith.constant 0 : index
    %c0_35 = arith.constant 0 : index
    %c0_36 = arith.constant 0 : index
    %108 = vector.load %arg10[%c0_34, %c0_35, %c0_36] : memref<1x1x128xf32, #tpu.memory_space<vmem>>, vector<1x1x128xf32>
    %109 = vector.shape_cast %108 : vector<1x1x128xf32> to vector<1x128xf32>
    %c0_37 = arith.constant 0 : index
    %c0_38 = arith.constant 0 : index
    %c0_39 = arith.constant 0 : index
    %110 = vector.load %arg11[%c0_37, %c0_38, %c0_39] : memref<1x1x128xf32, #tpu.memory_space<vmem>>, vector<1x1x128xf32>
    %111 = vector.shape_cast %110 : vector<1x1x128xf32> to vector<1x128xf32>
    %cst_40 = arith.constant dense<0.000000e+00> : vector<8xf32>
    %112 = vector.multi_reduction <add>, %107, %cst_40 [1] : vector<8x128xf32> to vector<8xf32>
    %113 = vector.shape_cast %112 : vector<8xf32> to vector<8x1xf32>
    %cst_41 = arith.constant 1.280000e+02 : f32
    %114 = vector.broadcast %cst_41 : f32 to vector<8x1xf32>
    %115 = arith.divf %113, %114 : vector<8x1xf32>
    %116 = vector.broadcast %115 : vector<8x1xf32> to vector<8x128xf32>
    %117 = arith.subf %107, %116 : vector<8x128xf32>
    %118 = arith.mulf %117, %117 : vector<8x128xf32>
    %cst_42 = arith.constant dense<0.000000e+00> : vector<8xf32>
    %119 = vector.multi_reduction <add>, %118, %cst_42 [1] : vector<8x128xf32> to vector<8xf32>
    %120 = vector.shape_cast %119 : vector<8xf32> to vector<8x1xf32>
    %cst_43 = arith.constant 1.280000e+02 : f32
    %121 = vector.broadcast %cst_43 : f32 to vector<8x1xf32>
    %122 = arith.divf %120, %121 : vector<8x1xf32>
    %123 = vector.broadcast %115 : vector<8x1xf32> to vector<8x128xf32>
    %124 = arith.subf %107, %123 : vector<8x128xf32>
    %cst_44 = arith.constant 9.99999996E-13 : f32
    %125 = vector.broadcast %cst_44 : f32 to vector<8x1xf32>
    %126 = arith.addf %122, %125 : vector<8x1xf32>
    %127 = math.rsqrt %126 : vector<8x1xf32>
    %128 = vector.broadcast %127 : vector<8x1xf32> to vector<8x128xf32>
    %129 = arith.mulf %124, %128 : vector<8x128xf32>
    %130 = vector.broadcast %109 : vector<1x128xf32> to vector<8x128xf32>
    %131 = arith.mulf %129, %130 : vector<8x128xf32>
    %132 = vector.broadcast %111 : vector<1x128xf32> to vector<8x128xf32>
    %133 = arith.addf %131, %132 : vector<8x128xf32>
    %134 = arith.truncf %133 : vector<8x128xf32> to vector<8x128xbf16>
    %c0_45 = arith.constant 0 : index
    %c0_46 = arith.constant 0 : index
    %c0_47 = arith.constant 0 : index
    %135 = vector.load %arg12[%c0_45, %c0_46, %c0_47] : memref<1x128x256xbf16, #tpu.memory_space<vmem>>, vector<1x128x256xbf16>
    %136 = vector.shape_cast %135 : vector<1x128x256xbf16> to vector<128x256xbf16>
    %cst_48 = arith.constant dense<0.000000e+00> : vector<8x256xf32>
    %137 = tpu.matmul %134, %136, %cst_48 {dimension_numbers = #tpu.dot_dimension_numbers<[1], [0], [0], [1], [0, 0, 1, 1], [], []>} : vector<8x128xbf16>, vector<128x256xbf16>, vector<8x256xf32> -> vector<8x256xf32>
    %c0_49 = arith.constant 0 : index
    %c0_50 = arith.constant 0 : index
    %c0_51 = arith.constant 0 : index
    %138 = vector.load %arg13[%c0_49, %c0_50, %c0_51] : memref<1x1x256xf32, #tpu.memory_space<vmem>>, vector<1x1x256xf32>
    %139 = vector.shape_cast %138 : vector<1x1x256xf32> to vector<1x256xf32>
    %140 = vector.broadcast %139 : vector<1x256xf32> to vector<8x256xf32>
    %141 = arith.addf %137, %140 : vector<8x256xf32>
    %142 = arith.mulf %141, %141 : vector<8x256xf32>
    %143 = arith.mulf %141, %142 : vector<8x256xf32>
    %cst_52 = arith.constant 4.471500e-02 : f32
    %144 = vector.broadcast %cst_52 : f32 to vector<8x256xf32>
    %145 = arith.mulf %144, %143 : vector<8x256xf32>
    %146 = arith.addf %141, %145 : vector<8x256xf32>
    %cst_53 = arith.constant 0.797884583 : f32
    %147 = vector.broadcast %cst_53 : f32 to vector<8x256xf32>
    %148 = arith.mulf %147, %146 : vector<8x256xf32>
    %149 = math.tanh %148 : vector<8x256xf32>
    %cst_54 = arith.constant 1.000000e+00 : f32
    %150 = vector.broadcast %cst_54 : f32 to vector<8x256xf32>
    %151 = arith.addf %150, %149 : vector<8x256xf32>
    %cst_55 = arith.constant 5.000000e-01 : f32
    %152 = vector.broadcast %cst_55 : f32 to vector<8x256xf32>
    %153 = arith.mulf %152, %151 : vector<8x256xf32>
    %154 = arith.mulf %141, %153 : vector<8x256xf32>
    %155 = arith.truncf %154 : vector<8x256xf32> to vector<8x256xbf16>
    %c0_56 = arith.constant 0 : index
    %c0_57 = arith.constant 0 : index
    %c0_58 = arith.constant 0 : index
    %156 = vector.load %arg14[%c0_56, %c0_57, %c0_58] : memref<1x256x128xbf16, #tpu.memory_space<vmem>>, vector<1x256x128xbf16>
    %157 = vector.shape_cast %156 : vector<1x256x128xbf16> to vector<256x128xbf16>
    %cst_59 = arith.constant dense<0.000000e+00> : vector<8x128xf32>
    %158 = tpu.matmul %155, %157, %cst_59 {dimension_numbers = #tpu.dot_dimension_numbers<[1], [0], [0], [1], [0, 0, 1, 1], [], []>} : vector<8x256xbf16>, vector<256x128xbf16>, vector<8x128xf32> -> vector<8x128xf32>
    %c0_60 = arith.constant 0 : index
    %c0_61 = arith.constant 0 : index
    %c0_62 = arith.constant 0 : index
    %159 = vector.load %arg15[%c0_60, %c0_61, %c0_62] : memref<1x1x128xf32, #tpu.memory_space<vmem>>, vector<1x1x128xf32>
    %160 = vector.shape_cast %159 : vector<1x1x128xf32> to vector<1x128xf32>
    %161 = vector.broadcast %160 : vector<1x128xf32> to vector<8x128xf32>
    %162 = arith.addf %158, %161 : vector<8x128xf32>
    %163 = arith.addf %133, %162 : vector<8x128xf32>
    %c0_63 = arith.constant 0 : index
    %c0_64 = arith.constant 0 : index
    %c0_65 = arith.constant 0 : index
    %164 = vector.load %arg16[%c0_63, %c0_64, %c0_65] : memref<1x1x128xf32, #tpu.memory_space<vmem>>, vector<1x1x128xf32>
    %165 = vector.shape_cast %164 : vector<1x1x128xf32> to vector<1x128xf32>
    %c0_66 = arith.constant 0 : index
    %c0_67 = arith.constant 0 : index
    %c0_68 = arith.constant 0 : index
    %166 = vector.load %arg17[%c0_66, %c0_67, %c0_68] : memref<1x1x128xf32, #tpu.memory_space<vmem>>, vector<1x1x128xf32>
    %167 = vector.shape_cast %166 : vector<1x1x128xf32> to vector<1x128xf32>
    %cst_69 = arith.constant dense<0.000000e+00> : vector<8xf32>
    %168 = vector.multi_reduction <add>, %163, %cst_69 [1] : vector<8x128xf32> to vector<8xf32>
    %169 = vector.shape_cast %168 : vector<8xf32> to vector<8x1xf32>
    %cst_70 = arith.constant 1.280000e+02 : f32
    %170 = vector.broadcast %cst_70 : f32 to vector<8x1xf32>
    %171 = arith.divf %169, %170 : vector<8x1xf32>
    %172 = vector.broadcast %171 : vector<8x1xf32> to vector<8x128xf32>
    %173 = arith.subf %163, %172 : vector<8x128xf32>
    %174 = arith.mulf %173, %173 : vector<8x128xf32>
    %cst_71 = arith.constant dense<0.000000e+00> : vector<8xf32>
    %175 = vector.multi_reduction <add>, %174, %cst_71 [1] : vector<8x128xf32> to vector<8xf32>
    %176 = vector.shape_cast %175 : vector<8xf32> to vector<8x1xf32>
    %cst_72 = arith.constant 1.280000e+02 : f32
    %177 = vector.broadcast %cst_72 : f32 to vector<8x1xf32>
    %178 = arith.divf %176, %177 : vector<8x1xf32>
    %179 = vector.broadcast %171 : vector<8x1xf32> to vector<8x128xf32>
    %180 = arith.subf %163, %179 : vector<8x128xf32>
    %cst_73 = arith.constant 9.99999996E-13 : f32
    %181 = vector.broadcast %cst_73 : f32 to vector<8x1xf32>
    %182 = arith.addf %178, %181 : vector<8x1xf32>
    %183 = math.rsqrt %182 : vector<8x1xf32>
    %184 = vector.broadcast %183 : vector<8x1xf32> to vector<8x128xf32>
    %185 = arith.mulf %180, %184 : vector<8x128xf32>
    %186 = vector.broadcast %165 : vector<1x128xf32> to vector<8x128xf32>
    %187 = arith.mulf %185, %186 : vector<8x128xf32>
    %188 = vector.broadcast %167 : vector<1x128xf32> to vector<8x128xf32>
    %189 = arith.addf %187, %188 : vector<8x128xf32>
    %c0_74 = arith.constant 0 : index
    %c0_75 = arith.constant 0 : index
    %190 = vector.load %arg19[%c0_74, %c0_75] : memref<8x128xf32, #tpu.memory_space<vmem>>, vector<8x128xf32>
    tpu.vector_store %arg19[%c0_74, %c0_75], %189 {strides = array<i32>} : memref<8x128xf32, #tpu.memory_space<vmem>>, vector<8x128xf32>,
    %c1_i32 = arith.constant 1 : i32
    %191 = arith.cmpi eq, %arg1, %c1_i32 : i32
    %192 = arith.extui %191 : i1 to i32
    %c0_i32_76 = arith.constant 0 : i32
    %193 = arith.cmpi ne, %192, %c0_i32_76 : i32
    scf.if %193 {
      %c0_77 = arith.constant 0 : index
      %c0_78 = arith.constant 0 : index
      %c0_79 = arith.constant 0 : index
      %194 = vector.load %arg18[%c0_77, %c0_78, %c0_79] : memref<1x8x128xf32, #tpu.memory_space<vmem>>, vector<1x8x128xf32>
      %195 = vector.shape_cast %194 : vector<1x8x128xf32> to vector<8x128xf32>
      %196 = vector.shape_cast %189 : vector<8x128xf32> to vector<1x8x128xf32>
      tpu.vector_store %arg18[%c0_77, %c0_78, %c0_79], %196 {strides = array<i32>} : memref<1x8x128xf32, #tpu.memory_space<vmem>>, vector<1x8x128xf32>,
    } else {
    }
    return
  }
  func.func @transform_0(%arg0: i32, %arg1: i32) -> (i32, i32, i32) {
    %c0_i32 = arith.constant 0 : i32
    %c0_i32_0 = arith.constant 0 : i32
    %c0_i32_1 = arith.constant 0 : i32
    return %arg0, %c0_i32, %c0_i32_0 : i32, i32, i32
  }
  func.func @transform_1(%arg0: i32, %arg1: i32) -> (i32, i32, i32) {
    %c0_i32 = arith.constant 0 : i32
    %c0_i32_0 = arith.constant 0 : i32
    %c0_i32_1 = arith.constant 0 : i32
    return %arg0, %c0_i32, %c0_i32_0 : i32, i32, i32
  }
  func.func @transform_2(%arg0: i32, %arg1: i32) -> (i32, i32) {
    %c0_i32 = arith.constant 0 : i32
    %c0_i32_0 = arith.constant 0 : i32
    %c0_i32_1 = arith.constant 0 : i32
    return %c0_i32, %c0_i32_0 : i32, i32
  }
  func.func @transform_3(%arg0: i32, %arg1: i32) -> (i32, i32) {
    %c0_i32 = arith.constant 0 : i32
    %c0_i32_0 = arith.constant 0 : i32
    %c0_i32_1 = arith.constant 0 : i32
    return %c0_i32, %c0_i32_0 : i32, i32
  }
  func.func @transform_4(%arg0: i32, %arg1: i32) -> (i32, i32, i32) {
    %c0_i32 = arith.constant 0 : i32
    %c0_i32_0 = arith.constant 0 : i32
    %c0_i32_1 = arith.constant 0 : i32
    return %arg1, %c0_i32, %c0_i32_0 : i32, i32, i32
  }
  func.func @transform_5(%arg0: i32, %arg1: i32) -> (i32, i32, i32) {
    %c0_i32 = arith.constant 0 : i32
    %c0_i32_0 = arith.constant 0 : i32
    %c0_i32_1 = arith.constant 0 : i32
    return %arg1, %c0_i32, %c0_i32_0 : i32, i32, i32
  }
  func.func @transform_6(%arg0: i32, %arg1: i32) -> (i32, i32, i32) {
    %c0_i32 = arith.constant 0 : i32
    %c0_i32_0 = arith.constant 0 : i32
    %c0_i32_1 = arith.constant 0 : i32
    return %arg1, %c0_i32, %c0_i32_0 : i32, i32, i32
  }
  func.func @transform_7(%arg0: i32, %arg1: i32) -> (i32, i32, i32) {
    %c0_i32 = arith.constant 0 : i32
    %c0_i32_0 = arith.constant 0 : i32
    %c0_i32_1 = arith.constant 0 : i32
    return %arg1, %c0_i32, %c0_i32_0 : i32, i32, i32
  }
  func.func @transform_8(%arg0: i32, %arg1: i32) -> (i32, i32, i32) {
    %c0_i32 = arith.constant 0 : i32
    %c0_i32_0 = arith.constant 0 : i32
    %c0_i32_1 = arith.constant 0 : i32
    return %arg1, %c0_i32, %c0_i32_0 : i32, i32, i32
  }
  func.func @transform_9(%arg0: i32, %arg1: i32) -> (i32, i32, i32) {
    %c0_i32 = arith.constant 0 : i32
    %c0_i32_0 = arith.constant 0 : i32
    %c0_i32_1 = arith.constant 0 : i32
    return %arg1, %c0_i32, %c0_i32_0 : i32, i32, i32
  }
  func.func @transform_10(%arg0: i32, %arg1: i32) -> (i32, i32, i32) {
    %c0_i32 = arith.constant 0 : i32
    %c0_i32_0 = arith.constant 0 : i32
    %c0_i32_1 = arith.constant 0 : i32
    return %arg1, %c0_i32, %c0_i32_0 : i32, i32, i32
  }
  func.func @transform_11(%arg0: i32, %arg1: i32) -> (i32, i32, i32) {
    %c0_i32 = arith.constant 0 : i32
    %c0_i32_0 = arith.constant 0 : i32
    %c0_i32_1 = arith.constant 0 : i32
    return %arg1, %c0_i32, %c0_i32_0 : i32, i32, i32
  }
  func.func @transform_12(%arg0: i32, %arg1: i32) -> (i32, i32, i32) {
    %c0_i32 = arith.constant 0 : i32
    %c0_i32_0 = arith.constant 0 : i32
    %c0_i32_1 = arith.constant 0 : i32
    return %arg1, %c0_i32, %c0_i32_0 : i32, i32, i32
  }
  func.func @transform_13(%arg0: i32, %arg1: i32) -> (i32, i32, i32) {
    %c0_i32 = arith.constant 0 : i32
    %c0_i32_0 = arith.constant 0 : i32
    %c0_i32_1 = arith.constant 0 : i32
    return %arg1, %c0_i32, %c0_i32_0 : i32, i32, i32
  }
  func.func @transform_14(%arg0: i32, %arg1: i32) -> (i32, i32, i32) {
    %c0_i32 = arith.constant 0 : i32
    %c0_i32_0 = arith.constant 0 : i32
    %c0_i32_1 = arith.constant 0 : i32
    return %arg1, %c0_i32, %c0_i32_0 : i32, i32, i32
  }
  func.func @transform_15(%arg0: i32, %arg1: i32) -> (i32, i32, i32) {
    %c0_i32 = arith.constant 0 : i32
    %c0_i32_0 = arith.constant 0 : i32
    %c0_i32_1 = arith.constant 0 : i32
    return %arg1, %c0_i32, %c0_i32_0 : i32, i32, i32
  }
  func.func @transform_16(%arg0: i32, %arg1: i32) -> (i32, i32, i32) {
    %c0_i32 = arith.constant 0 : i32
    %c0_i32_0 = arith.constant 0 : i32
    %c0_i32_1 = arith.constant 0 : i32
    return %arg0, %c0_i32, %c0_i32_0 : i32, i32, i32
  }
}

</mosaic_0001>

<bundles_post_ra>
// kernel: text_encoder_forward.3
= control target key start
LH: loop header
LB: loop body
LE: loop exit
PB: predicated region body
PF: predicated region fallthrough
CT: control target
= control target key end

     0   :  { %v181_v0 = vmov 0.0   ;;  %vm182_vm0 = vmmov 0   ;;  %s236_s1 = inlined_call_operand.vmem [shape: bf16[128,128], index: 1, kind: input, shape index: {}]   ;;  %s237_s0 = inlined_call_operand.vmem [shape: f32[8,128], index: 0, kind: input, shape index: {}]   ;;  %s238_s2 = inlined_call_operand.vmem [shape: f32[1,128], index: 2, kind: input, shape index: {}]   ;;  %s239_s3 = inlined_call_operand.vmem [shape: f32[8,128], index: 3, kind: output, shape index: {}]  }
   0x1   :  { %151 = vmatprep.subr.bf16.mxu0 %v181_v0  ;;  %v173_v1 = vld [vmem:[%s236_s1 + $0x38] sm:$0xff]   ;;  %167 = vmatprep.mubr.msk.bf16.mxu0 %vm182_vm0, %v181_v0  ;;  %v174_v2 = vld [vmem:[%s236_s1 + $0x30] sm:$0xff]   ;;  %v175_v3 = vld [vmem:[%s236_s1 + $0x28] sm:$0xff]  }
   0x2   :  { %152 = vmatpush3.bf16.msra.mxu0 %v173_v1  ;;  %v176_v4 = vld [vmem:[%s236_s1 + $0x20] sm:$0xff]   ;;  %v177_v5 = vld [vmem:[%s236_s1 + $0x18] sm:$0xff]   ;;  %v178_v6 = vld [vmem:[%s236_s1 + $0x10] sm:$0xff]  }
   0x3   :  { %153 = vmatprep.subr.bf16.mxu0 %v181_v0  ;;  %v179_v7 = vld [vmem:[%s236_s1 + $0x8] sm:$0xff]   ;;  %v180_v8 = vld [vmem:[%s236_s1] sm:$0xff]  }
   0x4   :  { %v15_v9 = vld [vmem:[%s237_s0] sm:$0xff] }
   0x5   :  { %v16_v10 = vpack.c.bf16 %v15_v9, %v15_v9  ;;  %v133_v11 = vld [vmem:[%s238_s2] ss:$0 sm:$0xff] }
   0x6   :  { %154 = vmatpush3.bf16.msra.mxu0 %v174_v2 }
   0x7   :  { %155 = vmatprep.subr.bf16.mxu0 %v181_v0 }
   0xa   :  { %156 = vmatpush3.bf16.msra.mxu0 %v175_v3 }
   0xb   :  { %157 = vmatprep.subr.bf16.mxu0 %v181_v0 }
   0xe   :  { %158 = vmatpush3.bf16.msra.mxu0 %v176_v4 }
   0xf   :  { %159 = vmatprep.subr.bf16.mxu0 %v181_v0 }
  0x12   :  { %160 = vmatpush3.bf16.msra.mxu0 %v177_v5 }
  0x13   :  { %161 = vmatprep.subr.bf16.mxu0 %v181_v0 }
  0x16   :  { %162 = vmatpush3.bf16.msra.mxu0 %v178_v6 }
  0x17   :  { %163 = vmatprep.subr.bf16.mxu0 %v181_v0 }
  0x1a   :  { %164 = vmatpush3.bf16.msra.mxu0 %v179_v7 }
  0x1b   :  { %165 = vmatprep.subr.bf16.mxu0 %v181_v0 }
  0x1e   :  { %166 = vmatpush3.bf16.msra.mxu0 %v180_v8 }
  0x21   :  { %168 = vmatmul.mubr.bf16.vlgmr.msra.gmra.mxu0 %v16_v10 }
  0xe1   :  { %v122_v12 = vpop.f32.mrf.mxu0 }
  0xe2   :  { %v123_v13 = vadd.f32 %v133_v11, %v122_v12 }
  0xe3   :  { %v169_v14 = vpop.f32.mrf.mxu0 }
  0xe4   :  { %128 = vst [vmem:[%s239_s3] sm:$0xff] %v123_v13 }
  0xe5   :  { %v125_v15 = vpop.f32.mrf.mxu0 }
  0xe7   :  { %v170_v16 = vpop.f32.mrf.mxu0 }

// kernel: text_encoder_forward.2
= control target key start
LH: loop header
LB: loop body
LE: loop exit
PB: predicated region body
PF: predicated region fallthrough
CT: control target
= control target key end

     0   :  { %s3483_s0 = inlined_call_operand.vmem [shape: f32[2,8,128], index: 0, kind: input, shape index: {}]   ;;  %s3484_s1 = inlined_call_operand.vmem [shape: f32[2,1,8], index: 1, kind: input, shape index: {}]   ;;  %s3485_s2 = inlined_call_operand.vmem [shape: f32[1,128], index: 2, kind: input, shape index: {}]   ;;  %s3486_s3 = inlined_call_operand.vmem [shape: f32[1,128], index: 3, kind: input, shape index: {}]   ;;  %s3487_s4 = inlined_call_operand.hbm [shape: bf16[2,128,384], index: 4, kind: input, shape index: {}]   ;;  %s3488_s5 = inlined_call_operand.vmem [shape: f32[2,1,384], index: 5, kind: input, shape index: {}]   ;;  %s3489_s6 = inlined_call_operand.vmem [shape: bf16[2,128,128], index: 6, kind: input, shape index: {}]   ;;  %s3490_s7 = inlined_call_operand.vmem [shape: f32[2,1,128], index: 7, kind: input, shape index: {}]   ;;  %s3491_s8 = inlined_call_operand.vmem [shape: f32[2,1,128], index: 8, kind: input, shape index: {}]   ;;  %s3492_s9 = inlined_call_operand.vmem [shape: f32[2,1,128], index: 9, kind: input, shape index: {}]   ;;  %s3493_s10 = inlined_call_operand.hbm [shape: bf16[2,128,256], index: 10, kind: input, shape index: {}]   ;;  %s3494_s11 = inlined_call_operand.vmem [shape: f32[2,1,256], index: 11, kind: input, shape index: {}]   ;;  %s3495_s12 = inlined_call_operand.hbm [shape: bf16[2,256,128], index: 12, kind: input, shape index: {}]   ;;  %s3496_s13 = inlined_call_operand.vmem [shape: f32[2,1,128], index: 13, kind: input, shape index: {}]   ;;  %s3497_s14 = inlined_call_operand.vmem [shape: f32[2,1,128], index: 14, kind: input, shape index: {}]   ;;  %s3498_s15 = inlined_call_operand.vmem [shape: f32[2,1,128], index: 15, kind: input, shape index: {}]   ;;  %s3499_s16 = inlined_call_operand.vmem [shape: f32[2,8,128], index: 16, kind: output, shape index: {}]  }
   0x1   :  { %3508 = sst [smem:[#allocation19_spill]] %s3483_s0 }
   0x2   :  { %3509 = sst [smem:[#allocation20_spill]] %s3485_s2 }
   0x3   :  { %3510 = sst [smem:[#allocation21_spill]] %s3486_s3 }
   0x4   :  { %3511 = sst [smem:[#allocation22_spill]] %s3487_s4 }
   0x5   :  { %3512 = sst [smem:[#allocation23_spill]] %s3488_s5 }
   0x6   :  { %3513 = sst [smem:[#allocation24_spill]] %s3489_s6 }
   0x7   :  { %3514 = sst [smem:[#allocation25_spill]] %s3490_s7 }
   0x8   :  { %3515 = sst [smem:[#allocation26_spill]] %s3491_s8 }
   0x9   :  { %3516 = sst [smem:[#allocation27_spill]] %s3492_s9 }
   0xa   :  { %3517 = sst [smem:[#allocation28_spill]] %s3493_s10 }
   0xb   :  { %3518 = sst [smem:[#allocation29_spill]] %s3494_s11 }
   0xc   :  { %3519 = sst [smem:[#allocation30_spill]] %s3495_s12 }
   0xd   :  { %3520 = sst [smem:[#allocation31_spill]] %s3496_s13 }
   0xe   :  { %3521 = sst [smem:[#allocation32_spill]] %s3497_s14 }
   0xf   :  { %3522 = sst [smem:[#allocation33_spill]] %s3498_s15 }
  0x10   :  { %3523 = sst [smem:[#allocation34_spill]] %s3499_s16 }
  0x11   :  { %21 = vsyncpa [#allocation4], 0 }
  0x12   :  { %23 = vsyncpa [#allocation4 + $0x1], 0 }
  0x13   :  { %24 = vsyncpa [#allocation6], 0 }
  0x14   :  { %26 = vsyncpa [#allocation6 + $0x1], 0  ;;  %s3020_s21 = smov 0   ;;  %s3022_s22 = smov 0  }
  0x15   :  { %s3024_s23 = smov 0   ;;  %s3026_s24 = smov 0  }
  0x16   :  { %s3028_s25 = smov 0   ;;  %s3030_s26 = smov 0  }
  0x17   :  { %s3032_s27 = smov 0   ;;  %s3034_s28 = smov 0  }
  0x18 LB: > { %3524 = sst [smem:[#allocation10_spill]] %s2894_s22  ;;  %s3502_s29 = sadd.s32 4294967295, %s2918_s28   ;;  %s2918_s28 = sphi %s3034_s28, %s32_s28   ;;  %s2914_s27 = sphi %s3032_s27, %s3571_s27   ;;  %s2910_s26 = sphi %s3030_s26, %s3570_s26   ;;  %s2906_s25 = sphi %s3028_s25, %s3569_s25   ;;  %s2902_s24 = sphi %s3026_s24, %s3568_s24   ;;  %s2898_s23 = sphi %s3024_s23, %s3567_s23   ;;  %s2894_s22 = sphi %s3022_s22, %s3566_s22   ;;  %s2890_s21 = sphi %s3020_s21, %s3565_s21  }
  0x19   : > { %3525 = sst [smem:[#allocation11_spill]] %s2898_s23  ;;  %s41_s30 = sadd.s32 1, %s2910_s26 }
  0x1a   : > { %3526 = sst [smem:[#allocation12_spill]] %s2910_s26  ;;  %p42_p0 = scmp.ge.s32.totalorder %s41_s30, 2 }
  0x1b   : > { %3527 = sst [smem:[#allocation13_spill]] %s2914_s27  ;;  %s44_s0 = sadd.s32 1, %s2914_s27 }
  0x1c   : > { %3528 = sst [smem:[#allocation14_spill]] %s2918_s28  ;;  %s145_s17 = sadd.s32 1, %s2898_s23 }
  0x1d   : > { %p152_p1 = scmp.ne.s32.totalorder %s2898_s23, %s2894_s22  ;;  %s3573_s30 = smov (%p42_p0, %s41_s30), 0 }
  0x1e   : > { %3529 = sst [smem:[#allocation15_spill]] %s3573_s30  ;;  %s3575_s0 = smov (!%p42_p0, %s44_s0), %s2914_s27 }
  0x1f   : > { %s142_s18 = ssub.s32 %s2910_s26, %s3573_s30  ;;  %p153_p2 = scmp.eq.s32.totalorder %s2918_s28, 0 }
  0x20   : > { %p46_p3 = scmp.ge.s32.totalorder %s3575_s0, 2  ;;  %p143_p4 = scmp.eq.s32.totalorder %s142_s18, 0 }
  0x21   : > { %p154_p5 = por %p153_p2, %p152_p1  ;;  %p158_p6 = scmp.ne.s32.totalorder %s2894_s22, %s2890_s21 }
  0x22   : > { %s3577_s0 = smov (%p46_p3, %s3575_s0), 0  ;;  %p159_p7 = scmp.eq.s32.totalorder %s3502_s29, 0 }
  0x23   : > { %3530 = sst [smem:[#allocation16_spill]] %s3577_s0  ;;  %p2581_p8 = scmp.lt.s32.totalorder %s2918_s28, 4 }
  0x24   : > { %s3074_s19 = scalar_select %p143_p4, %s2898_s23, %s145_s17  }
  0x25   : > { %s3080_s20 = sand.u32 1, %s2898_s23   ;;  %p3082_p9 = por %p159_p7, %p158_p6 }
  0x26   : > { %3531 = sst [smem:[#allocation17_spill]] %s3074_s19  ;;  %s567_s30 = sand.u32 1, %s2918_s28  }
  0x27   : > { %p3087_p10 = pnand %p2581_p8, %p154_p5  ;;  %s2315_s21 = sshll.u32 %s3080_s20, 7 }
  0x28   : > { %s2414_s17 = sshll.u32 %s2910_s26, 11  ;;  %s3534_s10 = sld [smem:[#allocation28_spill]] }
  0x29   : > { %s571_s19 = scalar_lea.vmem [#allocation5], %s2315_s21  ;;  %s3096_s2 = scalar_lea.sflag [#allocation6], %s567_s30 }
  0x2a   : > { %s578_s23 = sshll.u32 %s571_s19, 4  ;;  %p2766_p11 = pneg %p3087_p10  ;;  %s579_s23 = int_to_ptr.vmem [resolvable:$true] %s578_s23 }
  0x2b   : > { %s2777_s16 = scalar_lea.vmem %s579_s23, 2048  ;;  %s2920_s15 = smov [#allocation5]  }
  0x2c   : > { %p2778_p12 = scmp.ne.s32.totalorder %s579_s23, %s2777_s16  ;;  %s2782_s14 = sshll.u32 %s2920_s15, 4  ;;  %s2783_s14 = int_to_ptr.vmem [resolvable:$false] %s2782_s14 }
  0x2d   : > { %s2784_s11 = scalar_lea.vmem %s2783_s14, 4096  ;;  %p2785_p1 = scmp.lt.s32.totalorder %s579_s23, %s2783_s14 }
  0x2e   : > { %s577_s29 = scalar_lea.hbm %s3534_s10, %s2414_s17  ;;  %p2780_p13 = pnand %p2778_p12, %p2766_p11 }
  0x2f   : > { %p2786_p2 = scmp.lt.s32.totalorder %s2784_s11, %s2777_s16 }
  0x30   : > { %p2781_p0 = pneg %p2780_p13 }
  0x31   : > { %p2787_p3 = por %p2786_p2, %p2785_p1 }
  0x33   : > { %p2788_p4 = pnand %p2787_p3, %p2781_p0 }
  0x35   : > { %2791 = shalt.err (!%p2788_p4)
}
  0x36   : > { %s2921_s0 = smov 128   ;;  %s2922_s30 = smov 8  }
  0x37   : > { %2577 = dma.hbm_to_vmem [thread:$0]  (!%p3087_p10), %s577_s29, 2048, %s579_s23, %s3096_s2, %s2921_s0, %s2921_s0, %s2922_s30  }
  0x38   : > { %s3535_s12 = sld [smem:[#allocation30_spill]]  ;;  %s599_s11 = scalar_lea.vmem [#allocation7], %s2315_s21 }
  0x39   : > { %s606_s14 = sshll.u32 %s599_s11, 4  ;;  %p2321_p5 = scmp.ge.s32.totalorder %s2918_s28, 1  ;;  %s3111_s14 = int_to_ptr.vmem [resolvable:$true] %s606_s14 }
  0x3a   : > { %p632_p6 = scmp.lt.s32.totalorder %s2918_s28, 5  ;;  %s2561_s10 = smul.u32 192, %s3080_s20 }
  0x3b   : > { %s2562_s13 = smul.u32 3072, %s2910_s26  ;;  %s3537_s4 = sld [smem:[#allocation22_spill]] }
  0x3c   : > { %p3115_p7 = pnand %p2321_p5, %p632_p6  ;;  %s517_s0 = scalar_lea.vmem [#allocation3], %s2561_s10 }
  0x3d   : > { %s514_s30 = scalar_lea.sflag [#allocation4], %s3080_s20  ;;  %s2923_s19 = smov [#allocation3]  }
  0x3e   : > { %s3109_s18 = scalar_lea.hbm %s3535_s12, %s2414_s17  ;;  %s524_s17 = sshll.u32 %s517_s0, 4  ;;  %s525_s17 = int_to_ptr.vmem [resolvable:$true] %s524_s17 }
  0x3f   : > { %s2805_s21 = scalar_lea.vmem %s525_s17, 3072  ;;  %s2810_s15 = sshll.u32 %s2923_s19, 4  ;;  %s2811_s15 = int_to_ptr.vmem [resolvable:$false] %s2810_s15 }
  0x40   : > { %p2806_p8 = scmp.ne.s32.totalorder %s525_s17, %s2805_s21  ;;  %s2812_s11 = scalar_lea.vmem %s2811_s15, 6144 }
  0x41   : > { %s523_s29 = scalar_lea.hbm %s3537_s4, %s2562_s13  ;;  %p2813_p0 = scmp.lt.s32.totalorder %s525_s17, %s2811_s15 }
  0x42   : > { %p2808_p12 = pnand %p2806_p8, %p2766_p11  ;;  %p2814_p1 = scmp.lt.s32.totalorder %s2812_s11, %s2805_s21 }
  0x44   : > { %p2809_p13 = pneg %p2808_p12  ;;  %p2815_p2 = por %p2814_p1, %p2813_p0 }
  0x46   : > { %p2816_p3 = pnand %p2815_p2, %p2809_p13 }
  0x48   : > { %2819 = shalt.err (!%p2816_p3)
}
  0x49   : > { %s2924_s9 = smov 192   ;;  %s2925_s10 = smov 12  }
  0x4a   : > { %2574 = dma.hbm_to_vmem [thread:$0]  (!%p3087_p10), %s523_s29, 3072, %s525_s17, %s514_s30, %s2924_s9, %s2924_s9, %s2925_s10  }
  0x4b   : > { %s2833_s13 = scalar_lea.vmem %s3111_s14, 2048  ;;  %s2926_s20 = smov [#allocation7]  }
  0x4c   : > { %p2834_p4 = scmp.ne.s32.totalorder %s3111_s14, %s2833_s13  ;;  %s2838_s23 = sshll.u32 %s2926_s20, 4  ;;  %s2839_s23 = int_to_ptr.vmem [resolvable:$false] %s2838_s23 }
  0x4d   : > { %s2840_s0 = scalar_lea.vmem %s2839_s23, 4096  ;;  %p2841_p8 = scmp.lt.s32.totalorder %s3111_s14, %s2839_s23 }
  0x4e   : > { %p2836_p5 = pnand %p2834_p4, %p2766_p11  ;;  %p2842_p12 = scmp.lt.s32.totalorder %s2840_s0, %s2833_s13 }
  0x50   : > { %p2837_p6 = pneg %p2836_p5  ;;  %p2843_p13 = por %p2842_p12, %p2841_p8 }
  0x52   : > { %p2844_p0 = pnand %p2843_p13, %p2837_p6 }
  0x54   : > { %2847 = shalt.err (!%p2844_p0)
}
  0x55   : > { %s2927_s21 = smov 64   ;;  %s2928_s29 = smov 4  }
  0x56   : > { %2580 = dma.hbm_to_vmem [thread:$0]  (!%p3087_p10), %s3109_s18, 2048, %s3111_s14, %s3096_s2, %s2927_s21, %s2927_s21, %s2928_s29  }
  0x57   : > { %636 = sbr.rel (%p3115_p7) target bundleno = 3272 (0xcc8), region = 84 }
  0x5c   : > { %s3144_s17 = sand.u32 1, %s2894_s22  }
  0x5d   : > { %s2563_s30 = smul.u32 192, %s3144_s17  ;;  %s639_s19 = scalar_lea.sflag [#allocation4], %s3144_s17 }
  0x5f   : > { %s3148_s15 = scalar_lea.vmem [#allocation3], %s2563_s30 }
  0x60   : > { %2881 = dma.done.wait (%p3082_p9), %s639_s19, 3072  }
  0x61   : > { %2883 = vsyncadd (%p3082_p9), %s639_s19, 4294964224  ;;  %s3538_s2 = sadd.s32 4294967295, %s2918_s28   ;;  %s2322_s18 = sshll.u32 %s3144_s17, 7 }
  0x62   : > { %s647_s27 = sand.u32 1, %s3538_s2   ;;  %s3157_s16 = scalar_lea.vmem [#allocation5], %s2322_s18 }
  0x63   : > { %s648_s14 = scalar_lea.sflag [#allocation6], %s647_s27  ;;  %3539 = sst [smem:[#allocation18_spill]] %s3157_s16 }
  0x64   : > { %2885 = dma.done.wait (%p3082_p9), %s648_s14, 4096  }
  0x65   : > { %2887 = vsyncadd (%p3082_p9), %s648_s14, 4294963200  ;;  %p756_p10 = scmp.lt.s32.totalorder %s2906_s25, 1  ;;  %p763_p11 = scmp.lt.s32.totalorder %s2902_s24, 1 }
  0x66   : > { %s3540_s0 = sld [smem:[#allocation19_spill]]  ;;  %s3226_s2 = scalar_lea.vmem [#allocation7], %s2322_s18 }
  0x67   : > { %s3579_s25 = smov (!%p756_p10, %s2906_s25), 1  ;;  %s3542_s5 = sld [smem:[#allocation23_spill]] }
  0x68   : > { %s3169_s11 = scalar_select %p763_p11, %s2902_s24, 1 }
  0x69   : > { %s2324_s3 = sshll.u32 %s3579_s25, 3  ;;  %s3543_s6 = sld [smem:[#allocation24_spill]] }
  0x6a   : > { %s2564_s29 = smul.u32 3, %s3169_s11  ;;  %s2416_s17 = sshll.u32 %s3169_s11, 6 }
  0x6b   : > { %s2327_s30 = sshll.u32 %s3169_s11, 1  ;;  %s3546_s7 = sld [smem:[#allocation31_spill]] }
  0x6c   : > { %s759_s21 = scalar_lea.vmem %s3540_s0, %s2324_s3  ;;  %s3549_s20 = sld [smem:[#allocation33_spill]] }
  0x6d   : > { %s3188_s4 = scalar_lea.vmem %s3542_s5, %s2564_s29  ;;  %s3547_s5 = sld [smem:[#allocation29_spill]] }
  0x6e   : > { %s3550_s0 = sld [smem:[#allocation34_spill]]  ;;  %p2329_p9 = scmp.ne.s32.totalorder %s2902_s24, 0 }
  0x6f   : > { %s3193_s9 = scalar_lea.vmem %s3543_s6, %s2416_s17  ;;  %s3548_s17 = sld [smem:[#allocation32_spill]] }
  0x71   : > { %s787_s27 = scalar_lea.vmem %s3546_s7, %s3169_s11  ;;  %802 = sbr.rel (%p2329_p9) target bundleno = 426 (0x1aa), region = 100 }
  0x72   : > { %s793_s8 = scalar_lea.vmem %s3549_s20, %s3169_s11 }
  0x73   : > { %s3211_s16 = scalar_lea.vmem %s3547_s5, %s2327_s30  ;;  %s3552_s30 = sld [smem:[#allocation21_spill]] (!%p2329_p9) }
  0x74   : > { %s3224_s28 = scalar_lea.vmem %s3550_s0, %s2324_s3  ;;  %s3551_s3 = sld [smem:[#allocation20_spill]] (!%p2329_p9) }
  0x75   : > { %s790_s6 = scalar_lea.vmem %s3548_s17, %s3169_s11 }
  0x76   : > { %v803_v0 = vld [vmem:[%s759_s21] sm:$0xff] }
  0x77   : > { %806 = vadd.xlane.f32.xlu0 %v803_v0 }
  0x79   : > { %v2331_v11 = vld [vmem:[%s3552_s30] ss:$0 sm:$0xff] }
  0x7a   : > { %v2330_v9 = vld [vmem:[%s3551_s3] ss:$0 sm:$0xff] }
 0x100   : > { %v807_v1 = vpop.xlane.xlu0 %806 }
 0x101   : > { %v809_v2 = vmul.f32 0.0078125, %v807_v1 }
 0x103   : > { %v810_v3 = vsub.f32 %v803_v0, %v809_v2 }
 0x105   : > { %v811_v4 = vmul.f32 %v810_v3, %v810_v3 }
 0x107   : > { %812 = vadd.xlane.f32.xlu0 %v811_v4 }
 0x190   : > { %v813_v5 = vpop.xlane.xlu0 %812 }
 0x191   : > { %v814_v6 = vmul.f32 0.0078125, %v813_v5 }
 0x193   : > { %v815_v7 = vadd.f32 1e-12, %v814_v6 }
 0x195   : > { %2658 = vrsqrt.f32 %v815_v7 }
 0x1a2   : > { %v2659_v8 = vpop.eup %2658 }
 0x1a3   : > { %v817_v10 = vmul.f32 %v2659_v8, %v810_v3 }
 0x1a5   : > { %v824_v12 = vmul.f32 %v2330_v9, %v817_v10 }
 0x1a7   : > { %v831_v13 = vadd.f32 %v2331_v11, %v824_v12 }
 0x1a9   : > { %832 = vst [vmem:[#allocation2] sm:$0xff] %v831_v13 }
 0x1aa PF: > { %v2660_v14 = vld [vmem:[%s3148_s15 + $0xac] ss:$12 sps:$4 sm:$0xff]   ;;  %v2662_v15 = vld [vmem:[%s3148_s15 + $0xa8] ss:$12 sps:$4 sm:$0xff]   ;;  %v2929_v16 = vmov 0   ;;  %v2930_v17 = vmov 0.0   ;;  %v870_v42 = vlaneseq  ;;  %s3553_s14 = scalar_lea.vmem %s3484_s1, %s3579_s25 }
 0x1ab   : > { %1045 = vmatprep.mubr.bf16.mxu0 %v2929_v16  ;;  %2473 = vmatprep.subr.bf16.mxu1 %v2930_v17  ;;  %v2663_v18 = vld [vmem:[%s3148_s15 + $0x94] ss:$12 sps:$4 sm:$0xff]   ;;  %v2665_v19 = vld [vmem:[%s3148_s15 + $0x90] ss:$12 sps:$4 sm:$0xff]   ;;  %v2668_v21 = vld [vmem:[%s3148_s15 + $0x78] ss:$12 sps:$4 sm:$0xff]  }
 0x1ac   : > { %1013 = vmatprep.subr.bf16.mxu0 %v2660_v14  ;;  %v2666_v20 = vld [vmem:[%s3148_s15 + $0x7c] ss:$12 sps:$4 sm:$0xff]   ;;  %v2669_v22 = vld [vmem:[%s3148_s15 + $0x64] ss:$12 sps:$4 sm:$0xff]   ;;  %v2671_v23 = vld [vmem:[%s3148_s15 + $0x60] ss:$12 sps:$4 sm:$0xff]  }
 0x1ad   : > { %1014 = vmatpush1.bf16.msra.mxu0 %v2662_v15  ;;  %v2684_v24 = vld [vmem:[%s3148_s15 + $0xb0] ss:$12 sps:$4 sm:$0xff]   ;;  %v2672_v25 = vld [vmem:[%s3148_s15 + $0x4c] ss:$12 sps:$4 sm:$0xff]   ;;  %v2674_v27 = vld [vmem:[%s3148_s15 + $0x48] ss:$12 sps:$4 sm:$0xff]  }
 0x1ae   : > { %1015 = vmatprep.subr.bf16.mxu0 %v2663_v18  ;;  %2474 = vmatpush3.bf16.msra.mxu1 %v2684_v24  ;;  %v2685_v26 = vld [vmem:[%s3148_s15 + $0x98] ss:$12 sps:$4 sm:$0xff]   ;;  %v2675_v28 = vld [vmem:[%s3148_s15 + $0x34] ss:$12 sps:$4 sm:$0xff]   ;;  %v2677_v29 = vld [vmem:[%s3148_s15 + $0x30] ss:$12 sps:$4 sm:$0xff]  }
 0x1af   : > { %2475 = vmatprep.subr.bf16.mxu1 %v2930_v17  ;;  %v2686_v30 = vld [vmem:[%s3148_s15 + $0x80] ss:$12 sps:$4 sm:$0xff]   ;;  %v2678_v31 = vld [vmem:[%s3148_s15 + $0x1c] ss:$12 sps:$4 sm:$0xff]   ;;  %v2680_v33 = vld [vmem:[%s3148_s15 + $0x18] ss:$12 sps:$4 sm:$0xff]  }
 0x1b0   : > { %v2687_v32 = vld [vmem:[%s3148_s15 + $0x68] ss:$12 sps:$4 sm:$0xff]   ;;  %v2681_v34 = vld [vmem:[%s3148_s15 + $0x4] ss:$12 sps:$4 sm:$0xff]   ;;  %v2683_v36 = vld [vmem:[%s3148_s15] ss:$12 sps:$4 sm:$0xff]  }
 0x1b1   : > { %1016 = vmatpush1.bf16.msra.mxu0 %v2665_v19  ;;  %v2688_v35 = vld [vmem:[%s3148_s15 + $0x50] ss:$12 sps:$4 sm:$0xff]   ;;  %v2689_v38 = vld [vmem:[%s3148_s15 + $0x38] ss:$12 sps:$4 sm:$0xff]   ;;  %v2690_v40 = vld [vmem:[%s3148_s15 + $0x20] ss:$12 sps:$4 sm:$0xff]  }
 0x1b2   : > { %1017 = vmatprep.subr.bf16.mxu0 %v2666_v20  ;;  %2476 = vmatpush3.bf16.msra.mxu1 %v2685_v26  ;;  %v3261_v37 = vld [vmem:[#allocation2] sm:$0xff]  ;;  %v2691_v41 = vld [vmem:[%s3148_s15 + $0x8] ss:$12 sps:$4 sm:$0xff]   ;;  %vm2931_vm0 = vmmov 0   ;;  %v3280_v43 = vshrl.u32 %v870_v42, 7  ;;  %vm1102_vm1 = vcmask 261120  }
 0x1b3   : > { %2477 = vmatprep.subr.bf16.mxu1 %v2930_v17  ;;  %v835_v39 = vpack.c.bf16 %v3261_v37, %v3261_v37  ;;  %2489 = vmatprep.mubr.msk.bf16.mxu1 %vm2931_vm0, %v2930_v17  ;;  %v868_v46 = vld [vmem:[%s3188_s4] sm:$0x7]  ;;  %s2932_s15 = smov 96   ;;  %s2933_s4 = smov 64   ;;  %vm1166_vm2 = vcmask 1043456   ;;  %vm1149_vm3 = vcmask 64512  }
 0x1b4   : > { %v876_v44 = vsub.s32 1, %v3280_v43  ;;  %v872_v45 = vsub.s32 0, %v3280_v43  ;;  %s2934_s21 = smov 32   ;;  %v880_v58 = vsub.s32 2, %v3280_v43  ;;  %v3310_v3 = vld [vmem:[%s3553_s14] ss:$0 sm:$0xff] }
 0x1b5   : > { %1018 = vmatpush1.bf16.msra.mxu0 %v2668_v21  ;;  %vm1556_vm4 = vcmask 523264   ;;  %s3554_s25 = sld [smem:[#allocation18_spill]]  ;;  %vm1558_vm5 = vcmask 785408   ;;  %p2411_p7 = scmp.ne.s32.totalorder %s2902_s24, 1 }
 0x1b6   : > { %1019 = vmatprep.subr.bf16.mxu0 %v2669_v22  ;;  %2478 = vmatpush3.bf16.msra.mxu1 %v2686_v30  ;;  %v877_v47 = vrot.slane %v868_v46, %v876_v44  ;;  %v873_v49 = vrot.slane %v868_v46, %v872_v45  ;;  %v881_v59 = vrot.slane %v868_v46, %v880_v58  ;;  %s3555_s26 = sld [smem:[#allocation25_spill]] }
 0x1b7   : > { %2479 = vmatprep.subr.bf16.mxu1 %v2930_v17  ;;  %s3557_s23 = sld [smem:[#allocation26_spill]] }
 0x1b8   : > { %s3559_s7 = sld [smem:[#allocation27_spill]] }
 0x1b9   : > { %1020 = vmatpush1.bf16.msra.mxu0 %v2671_v23 }
 0x1ba   : > { %1021 = vmatprep.subr.bf16.mxu0 %v2672_v25  ;;  %2480 = vmatpush3.bf16.msra.mxu1 %v2687_v32 }
 0x1bb   : > { %2481 = vmatprep.subr.bf16.mxu1 %v2930_v17 }
 0x1bc   : > { %s3556_s17 = scalar_lea.vmem %s3555_s26, %s3169_s11 }
 0x1bd   : > { %1022 = vmatpush1.bf16.msra.mxu0 %v2674_v27  ;;  %s3558_s22 = scalar_lea.vmem %s3557_s23, %s3169_s11 }
 0x1be   : > { %1023 = vmatprep.subr.bf16.mxu0 %v2675_v28  ;;  %2482 = vmatpush3.bf16.msra.mxu1 %v2688_v35  ;;  %s3560_s3 = scalar_lea.vmem %s3559_s7, %s3169_s11 }
 0x1bf   : > { %2483 = vmatprep.subr.bf16.mxu1 %v2930_v17 }
 0x1c1   : > { %1024 = vmatpush1.bf16.msra.mxu0 %v2677_v29 }
 0x1c2   : > { %1025 = vmatprep.subr.bf16.mxu0 %v2678_v31  ;;  %2484 = vmatpush3.bf16.msra.mxu1 %v2689_v38 }
 0x1c3   : > { %2485 = vmatprep.subr.bf16.mxu1 %v2930_v17 }
 0x1c5   : > { %1026 = vmatpush1.bf16.msra.mxu0 %v2680_v33 }
 0x1c6   : > { %1027 = vmatprep.subr.bf16.mxu0 %v2681_v34  ;;  %2486 = vmatpush3.bf16.msra.mxu1 %v2690_v40 }
 0x1c7   : > { %2487 = vmatprep.subr.bf16.mxu1 %v2930_v17 }
 0x1c9   : > { %1028 = vmatpush1.bf16.msra.mxu0 %v2683_v36 }
 0x1ca   : > { %2517 = vmatprep.subr.bf16.mxu0 %v2930_v17  ;;  %2488 = vmatpush3.bf16.msra.mxu1 %v2691_v41 }
 0x1cb   : > { %2493 = vmatprep.subr.bf16.mxu1 %v2930_v17 }
 0x1cc   : > { %1046 = vmatmul.mubr.bf16.vlgmr.msra.gmra.mxu0 %v835_v39 }
 0x1cd   : > { %2519 = vmatprep.mubr.msk.bf16.mxu0 %vm2931_vm0, %v2930_v17  ;;  %2490 = vmatmul.mubr.bf16.vlgmr.msra.gmra.mxu1 %v835_v39 }
 0x1ce   : > { %2495 = vmatprep.mubr.msk.bf16.mxu1 %vm2931_vm0, %v2930_v17 }
 0x28c   : > { %v1047_v48 = vpop.f32.mrf.mxu0 }
 0x28d   : > { %v1048_v53 = vadd.f32 %v1047_v48, %v873_v49  ;;  %v1088_v60 = vpop.f32.mrf.mxu1 }
 0x28e   : > { %v1049_v50 = vpop.f32.mrf.mxu0  ;;  %v1089_v61 = vadd.f32 %v1088_v60, %v881_v59 }
 0x28f   : > { %v1050_v51 = vadd.f32 %v1049_v50, %v877_v47  ;;  %v1094_v57 = vpack.c.bf16 %v1048_v53, %v1048_v53  ;;  %v2491_v62 = vpop.f32.mrf.mxu1 }
 0x290   : > { %v1051_v52 = vpop.f32.mrf.mxu0  ;;  %v3300_v63 = vpack.c.bf16 %v1089_v61, %v1089_v61 }
 0x291   : > { %v1095_v54 = vpack.c.bf16 %v1050_v51, %v1050_v51  ;;  %v1091_v0 = vpop.f32.mrf.mxu1 }
 0x292   : > { %v1052_v55 = vpop.f32.mrf.mxu0  ;;  %v1168_v1 = vsel %vm1166_vm2, %v3300_v63, 0 }
 0x293   : > { %1214 = vrot.lane.b32.xlu1 %v1095_v54, %s2932_s15  ;;  %v1107_v56 = vsel %vm1102_vm1, %v1095_v54, 0  ;;  %v2492_v2 = vpop.f32.mrf.mxu1 }
 0x294   : > { %2494 = vmatpush3.bf16.xpose.msra.mxu1 %v1107_v56 }
 0x295   : > { %2499 = vmatprep.subr.bf16.mxu1 %v2930_v17 }
 0x297   : > { %1211 = vrot.lane.b32.xlu1 %v1094_v57, %s2932_s15 }
 0x29b   : > { %1323 = vrot.lane.b32.xlu1 %v1094_v57, %s2933_s4  ;;  %2496 = vmatmul.mubr.msk.bf16.vlgmr.msra.gmra.mxu1 %vm1102_vm1, %v1094_v57 }
 0x29c   : > { %2501 = vmatprep.mubr.msk.bf16.mxu1 %vm2931_vm0, %v2930_v17  ;;  %2500 = vmatpush3.bf16.msra.mxu1 %v1168_v1 }
 0x29d   : > { %2505 = vmatprep.subr.bf16.mxu1 %v2930_v17 }
 0x29f   : > { %1435 = vrot.lane.b32.xlu1 %v1095_v54, %s2934_s21 }
 0x2a3   : > { %1433 = vrot.lane.b32.xlu1 %v1094_v57, %s2934_s21 }
 0x305   : > { %v1215_v15 = vpop.permute.xlu1 %1214 }
 0x306   : > { %v1220_v28 = vsel %vm1102_vm1, %v1215_v15, 0 }
 0x309   : > { %v1212_v18 = vpop.permute.xlu1 %1211 }
 0x30d   : > { %v1324_v20 = vpop.permute.xlu1 %1323 }
 0x311   : > { %v1436_v23 = vpop.permute.xlu1 %1435 }
 0x312   : > { %v1441_v24 = vsel %vm1102_vm1, %v1436_v23, 0 }
 0x315   : > { %v1434_v29 = vpop.permute.xlu1 %1433 }
 0x35b   : > { %v1143_v4 = vpop.f32.mrf.mxu1 }
 0x35c   : > { %v1144_v5 = vadd.f32 %v3310_v3, %v1143_v4 }
 0x35d   : > { %v2497_v6 = vpop.f32.mrf.mxu1 }
 0x35e   : > { %v1150_v7 = vsel %vm1149_vm3, %v1144_v5, -inf }
 0x35f   : > { %1151 = vmax.xlane.f32.xlu0 %v1150_v7  ;;  %v1146_v8 = vpop.f32.mrf.mxu1 }
 0x361   : > { %v2498_v9 = vpop.f32.mrf.mxu1 }
 0x3e8   : > { %v1152_v10 = vpop.xlane.xlu0 %1151 }
 0x3e9   : > { %v1153_v11 = vsub.f32 %v1144_v5, %v1152_v10 }
 0x3eb   : > { %v1154_v12 = vmul.f32 1.442695, %v1153_v11 }
 0x3ed   : > { %2740 = vpow2.f32 %v1154_v12 }
 0x3fa   : > { %v2741_v13 = vpop.eup %2740 }
 0x3fb   : > { %v1156_v14 = vsel %vm1149_vm3, %v2741_v13, 0.0 }
 0x3fc   : > { %1157 = vadd.xlane.f32.xlu0 %v1156_v14 }
 0x412   : > { %1325 = vrot.lane.b32.xlu0 %v1095_v54, %s2933_s4 }
 0x485   : > { %v1158_v19 = vpop.xlane.xlu0 %1157 }
 0x486   : > { %2742 = vrcp.f32 %v1158_v19 }
 0x489   : > { %v1326_v21 = vpop.permute.xlu0 %1325 }
 0x48a   : > { %v1331_v22 = vsel %vm1102_vm1, %v1326_v21, 0 }
 0x48b   : > { %2518 = vmatpush3.bf16.xpose.msra.mxu0 %v1331_v22 }
 0x48c   : > { %2529 = vmatprep.subr.bf16.mxu0 %v2930_v17 }
 0x492   : > { %2520 = vmatmul.mubr.msk.bf16.vlgmr.msra.gmra.mxu0 %vm1102_vm1, %v1324_v20 }
 0x493   : > { %v2743_v25 = vpop.eup %2742  ;;  %2530 = vmatpush3.bf16.xpose.msra.mxu0 %v1441_v24  ;;  %2531 = vmatprep.mubr.msk.bf16.mxu0 %vm2931_vm0, %v2930_v17 }
 0x494   : > { %v1160_v26 = vmul.f32 %v2743_v25, %v2741_v13  ;;  %2541 = vmatprep.subr.bf16.mxu0 %v2930_v17 }
 0x496   : > { %v1161_v27 = vpack.c.bf16 %v1160_v26, %v1160_v26 }
 0x498   : > { %2502 = vmatmul.mubr.msk.bf16.vlgmr.msra.gmra.mxu1 %vm1149_vm3, %v1161_v27  ;;  %v2692_v27 = vld [vmem:[%s3193_s9 + $0x38] sm:$0xff]  }
 0x499   : > { %2506 = vmatpush3.bf16.xpose.msra.mxu1 %v1220_v28  ;;  %2507 = vmatprep.mubr.msk.bf16.mxu1 %vm2931_vm0, %v2930_v17  ;;  %v2693_v28 = vld [vmem:[%s3193_s9 + $0x30] sm:$0xff]  }
 0x49a   : > { %2532 = vmatmul.mubr.msk.bf16.vlgmr.msra.gmra.mxu0 %vm1102_vm1, %v1434_v29  ;;  %2511 = vmatprep.subr.bf16.mxu1 %v2930_v17  ;;  %v2694_v29 = vld [vmem:[%s3193_s9 + $0x28] sm:$0xff]  }
 0x49b   : > { %2557 = vmatprep.mubr.msk.bf16.mxu0 %vm2931_vm0, %v2930_v17  ;;  %2542 = vmatpush3.bf16.msra.mxu0 %v2692_v27 }
 0x49c   : > { %2543 = vmatprep.subr.bf16.mxu0 %v2930_v17 }
 0x49f   : > { %2544 = vmatpush3.bf16.msra.mxu0 %v2693_v28 }
 0x4a0   : > { %2508 = vmatmul.mubr.msk.bf16.vlgmr.msra.gmra.mxu1 %vm1102_vm1, %v1212_v18  ;;  %2545 = vmatprep.subr.bf16.mxu0 %v2930_v17 }
 0x4a1   : > { %2513 = vmatprep.mubr.msk.bf16.mxu1 %vm2931_vm0, %v2930_v17 }
 0x4a3   : > { %2546 = vmatpush3.bf16.msra.mxu0 %v2694_v29 }
 0x4a4   : > { %2547 = vmatprep.subr.bf16.mxu0 %v2930_v17 }
 0x552   : > { %v1367_v30 = vpop.f32.mrf.mxu0 }
 0x553   : > { %v1368_v31 = vadd.f32 %v3310_v3, %v1367_v30  ;;  %v2695_v30 = vld [vmem:[%s3193_s9 + $0x20] sm:$0xff]  }
 0x554   : > { %v2521_v32 = vpop.f32.mrf.mxu0  ;;  %2548 = vmatpush3.bf16.msra.mxu0 %v2695_v30  ;;  %v2724_v30 = vld [vmem:[%s3226_s2 + $0x78] sm:$0xff]  }
 0x555   : > { %v1373_v33 = vsel %vm1149_vm3, %v1368_v31, -inf  ;;  %2549 = vmatprep.subr.bf16.mxu0 %v2930_v17  ;;  %v2698_v32 = vld [vmem:[%s3193_s9 + $0x8] sm:$0xff]  }
 0x556   : > { %1374 = vmax.xlane.f32.xlu0 %v1373_v33  ;;  %v1370_v34 = vpop.f32.mrf.mxu0 }
 0x558   : > { %v3336_v35 = vpop.f32.mrf.mxu1  ;;  %v2522_v36 = vpop.f32.mrf.mxu0 }
 0x559   : > { %v2699_v36 = vld [vmem:[%s3193_s9] sm:$0xff]  }
 0x55a   : > { %v2503_v38 = vpop.f32.mrf.mxu1  ;;  %v1477_v39 = vpop.f32.mrf.mxu0 }
 0x55b   : > { %v1478_v51 = vadd.f32 %v3310_v3, %v1477_v39 }
 0x55c   : > { %v1207_v40 = vpop.f32.mrf.mxu1  ;;  %v2533_v41 = vpop.f32.mrf.mxu0 }
 0x55d   : > { %v1483_v55 = vsel %vm1149_vm3, %v1478_v51, -inf }
 0x55e   : > { %v2504_v42 = vpop.f32.mrf.mxu1  ;;  %v1480_v46 = vpop.f32.mrf.mxu0 }
 0x560   : > { %v1256_v47 = vpop.f32.mrf.mxu1  ;;  %v2534_v48 = vpop.f32.mrf.mxu0 }
 0x561   : > { %v1257_v49 = vadd.f32 %v3310_v3, %v1256_v47 }
 0x562   : > { %v2509_v50 = vpop.f32.mrf.mxu1 }
 0x563   : > { %v1262_v52 = vsel %vm1149_vm3, %v1257_v49, -inf }
 0x564   : > { %1263 = vmax.xlane.f32.xlu1 %v1262_v52  ;;  %v1259_v53 = vpop.f32.mrf.mxu1 }
 0x566   : > { %v2510_v54 = vpop.f32.mrf.mxu1 }
 0x568   : > { %1484 = vmax.xlane.f32.xlu1 %v1483_v55 }
 0x5df   : > { %v1375_v56 = vpop.xlane.xlu0 %1374 }
 0x5e0   : > { %v1376_v57 = vsub.f32 %v1368_v31, %v1375_v56  ;;  %v2696_v31 = vld [vmem:[%s3193_s9 + $0x18] sm:$0xff]  }
 0x5e1   : > { %2550 = vmatpush3.bf16.msra.mxu0 %v2696_v31  ;;  %v2725_v31 = vld [vmem:[%s3226_s2 + $0x38] sm:$0xff]  }
 0x5e2   : > { %v1377_v58 = vmul.f32 1.442695, %v1376_v57  ;;  %2551 = vmatprep.subr.bf16.mxu0 %v2930_v17  ;;  %v2365_v57 = vld [vmem:[%s3556_s17] ss:$0 sm:$0xff] }
 0x5e4   : > { %2744 = vpow2.f32 %v1377_v58 }
 0x5ed   : > { %v1264_v59 = vpop.xlane.xlu1 %1263 }
 0x5ee   : > { %v1265_v60 = vsub.f32 %v1257_v49, %v1264_v59 }
 0x5f0   : > { %v1266_v2 = vmul.f32 1.442695, %v1265_v60 }
 0x5f1   : > { %v2745_v61 = vpop.eup %2744  ;;  %v1485_v62 = vpop.xlane.xlu1 %1484 }
 0x5f2   : > { %v1486_v0 = vsub.f32 %v1478_v51, %v1485_v62  ;;  %v1379_v1 = vsel %vm1149_vm3, %v2745_v61, 0.0 }
 0x5f3   : > { %1380 = vadd.xlane.f32.xlu0 %v1379_v1  ;;  %v2702_v1 = vld [vmem:[%s3554_s25 + $0x74] ss:$8 sps:$4 sm:$0xff]  }
 0x5f4   : > { %v1487_v3 = vmul.f32 1.442695, %v1486_v0  ;;  %v2700_v0 = vld [vmem:[%s3554_s25 + $0x70] ss:$8 sps:$4 sm:$0xff]  }
 0x5f6   : > { %2746 = vpow2.f32 %v1487_v3  ;;  %v2703_v3 = vld [vmem:[%s3554_s25 + $0x60] ss:$8 sps:$4 sm:$0xff]  }
 0x5f7   : > { %2748 = vpow2.f32 %v1266_v2  ;;  %v2705_v2 = vld [vmem:[%s3554_s25 + $0x64] ss:$8 sps:$4 sm:$0xff]  }
 0x603   : > { %v2747_v4 = vpop.eup %2746 }
 0x604   : > { %v1489_v5 = vsel %vm1149_vm3, %v2747_v4, 0.0  ;;  %v2749_v6 = vpop.eup %2748 }
 0x605   : > { %1490 = vadd.xlane.f32.xlu1 %v1489_v5  ;;  %v1268_v7 = vsel %vm1149_vm3, %v2749_v6, 0.0 }
 0x609   : > { %1275 = vrot.lane.b32.xlu0 %v3300_v63, %s2932_s15  ;;  %1269 = vadd.xlane.f32.xlu1 %v1268_v7  ;;  %v2708_v7 = vld [vmem:[%s3554_s25 + $0x54] ss:$8 sps:$4 sm:$0xff]  }
 0x61a   : > { %1385 = vrot.lane.b32.xlu1 %v3300_v63, %s2933_s4 }
 0x61e   : > { %1495 = vrot.lane.b32.xlu1 %v3300_v63, %s2934_s21 }
 0x67c   : > { %v1381_v8 = vpop.xlane.xlu0 %1380 }
 0x680   : > { %v1276_v9 = vpop.permute.xlu0 %1275 }
 0x681   : > { %v1281_v10 = vsel %vm1166_vm2, %v1276_v9, 0  ;;  %v2709_v9 = vld [vmem:[%s3554_s25 + $0x40] ss:$8 sps:$4 sm:$0xff]  }
 0x682   : > { %2512 = vmatpush3.bf16.msra.mxu1 %v1281_v10  ;;  %v2711_v10 = vld [vmem:[%s3554_s25 + $0x44] ss:$8 sps:$4 sm:$0xff]  }
 0x683   : > { %2523 = vmatprep.subr.bf16.mxu1 %v2930_v17 }
 0x68e   : > { %v1491_v11 = vpop.xlane.xlu1 %1490 }
 0x692   : > { %v1270_v12 = vpop.xlane.xlu1 %1269 }
 0x693   : > { %2750 = vrcp.f32 %v1270_v12  ;;  %v2712_v12 = vld [vmem:[%s3554_s25 + $0x30] ss:$8 sps:$4 sm:$0xff]  }
 0x694   : > { %2752 = vrcp.f32 %v1381_v8  ;;  %v2706_v8 = vld [vmem:[%s3554_s25 + $0x50] ss:$8 sps:$4 sm:$0xff]  }
 0x695   : > { %2754 = vrcp.f32 %v1491_v11  ;;  %v2714_v11 = vld [vmem:[%s3554_s25 + $0x34] ss:$8 sps:$4 sm:$0xff]  }
 0x696   : > { %v1386_v15 = vpop.permute.xlu1 %1385 }
 0x697   : > { %v1391_v20 = vsel %vm1166_vm2, %v1386_v15, 0  ;;  %v2720_v15 = vld [vmem:[%s3554_s25 + $0x14] ss:$8 sps:$4 sm:$0xff]  }
 0x69a   : > { %v1496_v21 = vpop.permute.xlu1 %1495 }
 0x69b   : > { %v1501_v24 = vsel %vm1166_vm2, %v1496_v21, 0 }
 0x6a0   : > { %v2751_v13 = vpop.eup %2750 }
 0x6a1   : > { %v1272_v14 = vmul.f32 %v2751_v13, %v2749_v6  ;;  %v2753_v19 = vpop.eup %2752  ;;  %v2717_v13 = vld [vmem:[%s3554_s25 + $0x24] ss:$8 sps:$4 sm:$0xff]  }
 0x6a2   : > { %v1383_v63 = vmul.f32 %v2753_v19, %v2745_v61  ;;  %v2755_v23 = vpop.eup %2754  ;;  %v2723_v19 = vld [vmem:[%s3554_s25 + $0x4] ss:$8 sps:$4 sm:$0xff]  }
 0x6a3   : > { %v1273_v18 = vpack.c.bf16 %v1272_v14, %v1272_v14  ;;  %v1493_v25 = vmul.f32 %v2755_v23, %v2747_v4  ;;  %v2715_v14 = vld [vmem:[%s3554_s25 + $0x20] ss:$8 sps:$4 sm:$0xff]  }
 0x6a4   : > { %v1384_v22 = vpack.c.bf16 %v1383_v63, %v1383_v63 }
 0x6a5   : > { %2514 = vmatmul.mubr.msk.bf16.vlgmr.msra.gmra.mxu1 %vm1149_vm3, %v1273_v18  ;;  %v1494_v26 = vpack.c.bf16 %v1493_v25, %v1493_v25  ;;  %v2718_v18 = vld [vmem:[%s3554_s25 + $0x10] ss:$8 sps:$4 sm:$0xff]  }
 0x6a6   : > { %2524 = vmatpush3.bf16.msra.mxu1 %v1391_v20  ;;  %2525 = vmatprep.mubr.msk.bf16.mxu1 %vm2931_vm0, %v2930_v17  ;;  %v2721_v20 = vld [vmem:[%s3554_s25] ss:$8 sps:$4 sm:$0xff]  }
 0x6a7   : > { %2535 = vmatprep.subr.bf16.mxu1 %v2930_v17 }
 0x6ad   : > { %2526 = vmatmul.mubr.msk.bf16.vlgmr.msra.gmra.mxu1 %vm1149_vm3, %v1384_v22 }
 0x6ae   : > { %2536 = vmatpush3.bf16.msra.mxu1 %v1501_v24  ;;  %2537 = vmatprep.mubr.msk.bf16.mxu1 %vm2931_vm0, %v2930_v17  ;;  %v2374_v24 = vld [vmem:[%s3558_s22] ss:$0 sm:$0xff] }
 0x6af   : > { %1810 = vmatprep.subr.bf16.mxu1 %v2702_v1 }
 0x6b5   : > { %2538 = vmatmul.mubr.msk.bf16.vlgmr.msra.gmra.mxu1 %vm1149_vm3, %v1494_v26  ;;  %v2375_v26 = vld [vmem:[%s3560_s3] ss:$0 sm:$0xff] }
 0x6b6   : > { %1842 = vmatprep.mubr.bf16.mxu1 %v2929_v16  ;;  %v2697_v16 = vld [vmem:[%s3193_s9 + $0x10] sm:$0xff]   ;;  %1811 = vmatpush1.bf16.msra.mxu1 %v2700_v0 }
 0x6b7   : > { %2552 = vmatpush3.bf16.msra.mxu0 %v2697_v16  ;;  %1812 = vmatprep.subr.bf16.mxu1 %v2705_v2  ;;  %v2726_v16 = vld [vmem:[%s3226_s2 + $0x70] sm:$0xff]  }
 0x6b8   : > { %2553 = vmatprep.subr.bf16.mxu0 %v2930_v17 }
 0x6ba   : > { %1813 = vmatpush1.bf16.msra.mxu1 %v2703_v3 }
 0x6bb   : > { %2554 = vmatpush3.bf16.msra.mxu0 %v2698_v32  ;;  %1814 = vmatprep.subr.bf16.mxu1 %v2708_v7  ;;  %v2727_v32 = vld [vmem:[%s3226_s2 + $0x30] sm:$0xff]  }
 0x6bc   : > { %2555 = vmatprep.subr.bf16.mxu0 %v2930_v17 }
 0x6be   : > { %1815 = vmatpush1.bf16.msra.mxu1 %v2706_v8 }
 0x6bf   : > { %2556 = vmatpush3.bf16.msra.mxu0 %v2699_v36  ;;  %1816 = vmatprep.subr.bf16.mxu1 %v2711_v10  ;;  %v2730_v36 = vld [vmem:[%s3226_s2 + $0x60] sm:$0xff]  }
 0x6c0   : > { %2451 = vmatprep.subr.bf16.mxu0 %v2724_v30 }
 0x6c2   : > { %1817 = vmatpush1.bf16.msra.mxu1 %v2709_v9 }
 0x6c3   : > { %1818 = vmatprep.subr.bf16.mxu1 %v2714_v11  ;;  %v2392_v11 = vld [vmem:[%s787_s27] ss:$0 sm:$0xff] }
 0x6c6   : > { %1819 = vmatpush1.bf16.msra.mxu1 %v2712_v12 }
 0x6c7   : > { %1820 = vmatprep.subr.bf16.mxu1 %v2717_v13 }
 0x6ca   : > { %1821 = vmatpush1.bf16.msra.mxu1 %v2715_v14 }
 0x6cb   : > { %1822 = vmatprep.subr.bf16.mxu1 %v2720_v15 }
 0x6ce   : > { %1823 = vmatpush1.bf16.msra.mxu1 %v2718_v18 }
 0x6cf   : > { %1824 = vmatprep.subr.bf16.mxu1 %v2723_v19 }
 0x6d2   : > { %1825 = vmatpush1.bf16.msra.mxu1 %v2721_v20 }
 0x765   : > { %v1317_v33 = vpop.f32.mrf.mxu1 }
 0x766   : > { %1544 = vrot.lane.b32.xlu0 %v1317_v33, %s2934_s21  ;;  %v2728_v33 = vld [vmem:[%s3226_s2 + $0x68] sm:$0xff]  }
 0x767   : > { %v2515_v34 = vpop.f32.mrf.mxu1 }
 0x768   : > { %v2729_v34 = vld [vmem:[%s3226_s2 + $0x28] sm:$0xff]  }
 0x769   : > { %v1320_v38 = vpop.f32.mrf.mxu1 }
 0x76a   : > { %v2731_v38 = vld [vmem:[%s3226_s2 + $0x20] sm:$0xff]  }
 0x76b   : > { %v2516_v39 = vpop.f32.mrf.mxu1 }
 0x76c   : > { %v2732_v39 = vld [vmem:[%s3226_s2 + $0x58] sm:$0xff]  }
 0x76d   : > { %v1427_v40 = vpop.f32.mrf.mxu1 }
 0x76e   : > { %1548 = vrot.lane.b32.xlu1 %v1427_v40, %s2933_s4  ;;  %v2733_v40 = vld [vmem:[%s3226_s2 + $0x18] sm:$0xff]  }
 0x76f   : > { %v2527_v41 = vpop.f32.mrf.mxu1 }
 0x770   : > { %v2734_v41 = vld [vmem:[%s3226_s2 + $0x50] sm:$0xff]  }
 0x771   : > { %v1430_v42 = vpop.f32.mrf.mxu1 }
 0x772   : > { %v2735_v42 = vld [vmem:[%s3226_s2 + $0x10] sm:$0xff]  }
 0x773   : > { %v2528_v46 = vpop.f32.mrf.mxu1 }
 0x774   : > { %v2736_v46 = vld [vmem:[%s3226_s2 + $0x48] sm:$0xff]  }
 0x775   : > { %v1537_v47 = vpop.f32.mrf.mxu1 }
 0x776   : > { %1552 = vrot.lane.b32.xlu0 %v1537_v47, %s2932_s15  ;;  %v2737_v47 = vld [vmem:[%s3226_s2 + $0x8] sm:$0xff]  }
 0x777   : > { %v2539_v48 = vpop.f32.mrf.mxu1 }
 0x778   : > { %v2738_v48 = vld [vmem:[%s3226_s2 + $0x40] sm:$0xff]  }
 0x779   : > { %v1540_v49 = vpop.f32.mrf.mxu1 }
 0x77a   : > { %v2739_v49 = vld [vmem:[%s3226_s2] sm:$0xff]  }
 0x77b   : > { %v2540_v50 = vpop.f32.mrf.mxu1 }
 0x77c   : > { %v1718_v50 = vld [vmem:[%s3211_s16] sm:$0x3] }
 0x7d8   : > { %v1545_v51 = vpop.permute.xlu0 %1544 }
 0x7d9   : > { %v1555_v52 = vsel %vm1102_vm1, %v3336_v35, %v1545_v51  ;;  %v1723_v51 = vrot.slane %v1718_v50, %v872_v45 }
 0x7e0   : > { %v1549_v17 = vpop.permute.xlu1 %1548 }
 0x7e1   : > { %v1557_v53 = vsel %vm1556_vm4, %v1555_v52, %v1549_v17  ;;  %v1727_v17 = vrot.slane %v1718_v50, %v876_v44 }
 0x7e8   : > { %v1553_v54 = vpop.permute.xlu0 %1552 }
 0x7e9   : > { %v1559_v55 = vsel %vm1558_vm5, %v1557_v53, %v1553_v54 }
 0x7ea   : > { %v1560_v56 = vpack.c.bf16 %v1559_v55, %v1559_v55 }
 0x7ec   : > { %2558 = vmatmul.mubr.bf16.vlgmr.msra.gmra.mxu0 %v1560_v56 }
 0x7ed   : > { %2452 = vmatpush3.bf16.msra.mxu0 %v2725_v31 }
 0x7ee   : > { %2453 = vmatprep.subr.bf16.mxu0 %v2726_v16 }
 0x7f1   : > { %2454 = vmatpush3.bf16.msra.mxu0 %v2727_v32 }
 0x7f2   : > { %2455 = vmatprep.subr.bf16.mxu0 %v2728_v33 }
 0x7f5   : > { %2456 = vmatpush3.bf16.msra.mxu0 %v2729_v34 }
 0x7f6   : > { %2457 = vmatprep.subr.bf16.mxu0 %v2730_v36 }
 0x7f9   : > { %2458 = vmatpush3.bf16.msra.mxu0 %v2731_v38 }
 0x7fa   : > { %2459 = vmatprep.subr.bf16.mxu0 %v2732_v39 }
 0x7fd   : > { %2460 = vmatpush3.bf16.msra.mxu0 %v2733_v40 }
 0x7fe   : > { %2461 = vmatprep.subr.bf16.mxu0 %v2734_v41 }
 0x801   : > { %2462 = vmatpush3.bf16.msra.mxu0 %v2735_v42 }
 0x802   : > { %2463 = vmatprep.subr.bf16.mxu0 %v2736_v46 }
 0x805   : > { %2464 = vmatpush3.bf16.msra.mxu0 %v2737_v47 }
 0x806   : > { %2465 = vmatprep.subr.bf16.mxu0 %v2738_v48 }
 0x809   : > { %2466 = vmatpush3.bf16.msra.mxu0 %v2739_v49 }
 0x8ac   : > { %v1666_v58 = vpop.f32.mrf.mxu0 }
 0x8ad   : > { %v1667_v59 = vadd.f32 %v2365_v57, %v1666_v58 }
 0x8ae   : > { %v2559_v60 = vpop.f32.mrf.mxu0 }
 0x8af   : > { %v1672_v61 = vadd.f32 %v1667_v59, %v3261_v37 }
 0x8b0   : > { %v1669_v62 = vpop.f32.mrf.mxu0 }
 0x8b1   : > { %1675 = vadd.xlane.f32.xlu1 %v1672_v61 }
 0x8b2   : > { %v2560_v35 = vpop.f32.mrf.mxu0 }
 0x93a   : > { %v1676_v4 = vpop.xlane.xlu1 %1675 }
 0x93b   : > { %v1678_v37 = vmul.f32 0.0078125, %v1676_v4 }
 0x93d   : > { %v1679_v5 = vsub.f32 %v1672_v61, %v1678_v37 }
 0x93f   : > { %v1680_v6 = vmul.f32 %v1679_v5, %v1679_v5 }
 0x941   : > { %1681 = vadd.xlane.f32.xlu0 %v1680_v6 }
 0x9ca   : > { %v1682_v63 = vpop.xlane.xlu0 %1681 }
 0x9cb   : > { %v1683_v21 = vmul.f32 0.0078125, %v1682_v63 }
 0x9cd   : > { %v1684_v22 = vadd.f32 1e-12, %v1683_v21 }
 0x9cf   : > { %2756 = vrsqrt.f32 %v1684_v22 }
 0x9dc   : > { %v2757_v23 = vpop.eup %2756 }
 0x9dd   : > { %v1686_v25 = vmul.f32 %v2757_v23, %v1679_v5 }
 0x9df   : > { %v1693_v27 = vmul.f32 %v2374_v24, %v1686_v25 }
 0x9e1   : > { %v3416_v28 = vadd.f32 %v2375_v26, %v1693_v27  ;;  %v2409_v27 = vld [vmem:[%s790_s6] ss:$0 sm:$0xff] }
 0x9e3   : > { %v1701_v29 = vpack.c.bf16 %v3416_v28, %v3416_v28 }
 0x9e5   : > { %1843 = vmatmul.mubr.bf16.vlgmr.msra.gmra.mxu1 %v1701_v29 }
 0xaa5   : > { %v1844_v52 = vpop.f32.mrf.mxu1 }
 0xaa6   : > { %v1845_v53 = vadd.f32 %v1844_v52, %v1723_v51 }
 0xaa7   : > { %v1846_v54 = vpop.f32.mrf.mxu1 }
 0xaa8   : > { %v1851_v55 = vmul.f32 %v1845_v53, %v1845_v53  ;;  %v1847_v56 = vadd.f32 %v1846_v54, %v1727_v17 }
 0xaa9   : > { %v1848_v57 = vpop.f32.mrf.mxu1 }
 0xaaa   : > { %v1853_v58 = vmul.f32 %v1851_v55, %v1845_v53  ;;  %v1852_v59 = vmul.f32 %v1847_v56, %v1847_v56 }
 0xaab   : > { %v1849_v60 = vpop.f32.mrf.mxu1 }
 0xaac   : > { %v1855_v61 = vmul.f32 0.044715, %v1853_v58  ;;  %v1854_v62 = vmul.f32 %v1852_v59, %v1847_v56 }
 0xaae   : > { %v1857_v35 = vadd.f32 %v1855_v61, %v1845_v53  ;;  %v1856_v0 = vmul.f32 0.044715, %v1854_v62 }
 0xab0   : > { %v1859_v1 = vmul.f32 0.7978846, %v1857_v35  ;;  %v1858_v2 = vadd.f32 %v1856_v0, %v1847_v56 }
 0xab2   : > { %2758 = vtanh.f32 %v1859_v1  ;;  %v1860_v45 = vmul.f32 0.7978846, %v1858_v2 }
 0xab4   : > { %2760 = vtanh.f32 %v1860_v45 }
 0xabf   : > { %v2759_v43 = vpop.eup %2758 }
 0xac0   : > { %v1863_v44 = vadd.f32 1.0, %v2759_v43 }
 0xac1   : > { %v2761_v3 = vpop.eup %2760 }
 0xac2   : > { %v1864_v4 = vadd.f32 1.0, %v2761_v3  ;;  %v1865_v37 = vmul.f32 0.5, %v1863_v44 }
 0xac4   : > { %v1866_v5 = vmul.f32 0.5, %v1864_v4  ;;  %v1867_v6 = vmul.f32 %v1865_v37, %v1845_v53 }
 0xac6   : > { %v1868_v7 = vmul.f32 %v1866_v5, %v1847_v56  ;;  %v1869_v9 = vpack.c.bf16 %v1867_v6, %v1867_v6 }
 0xac8   : > { %v1870_v8 = vpack.c.bf16 %v1868_v7, %v1868_v7 }
 0xaca   : > { %2038 = vmatprep.mubr.bf16.mxu0 %v1870_v8 }
 0xacb   : > { %2039 = vmatmul.mubr.bf16.vlgmr.msra.gmra.mxu0 %v1869_v9 }
 0xb8b   : > { %v2467_v10 = vpop.f32.mrf.mxu0 }
 0xb8d   : > { %v2468_v12 = vpop.f32.mrf.mxu0 }
 0xb8e   : > { %v2469_v13 = vadd.f32 %v2468_v12, %v2467_v10 }
 0xb8f   : > { %v2470_v14 = vpop.f32.mrf.mxu0 }
 0xb90   : > { %v2041_v15 = vadd.f32 %v2469_v13, %v2392_v11 }
 0xb91   : > { %v2471_v18 = vpop.f32.mrf.mxu0 }
 0xb92   : > { %v2046_v19 = vadd.f32 %v2041_v15, %v3416_v28  ;;  %v2410_v28 = vld [vmem:[%s793_s8] ss:$0 sm:$0xff] }
 0xb94   : > { %2049 = vadd.xlane.f32.xlu0 %v2046_v19 }
 0xc1d   : > { %v2050_v20 = vpop.xlane.xlu0 %2049 }
 0xc1e   : > { %v2051_v63 = vmul.f32 0.0078125, %v2050_v20 }
 0xc20   : > { %v2052_v21 = vsub.f32 %v2046_v19, %v2051_v63 }
 0xc22   : > { %v2053_v22 = vmul.f32 %v2052_v21, %v2052_v21 }
 0xc24   : > { %2054 = vadd.xlane.f32.xlu1 %v2053_v22 }
 0xcad   : > { %v2055_v23 = vpop.xlane.xlu1 %2054 }
 0xcae   : > { %v2056_v24 = vmul.f32 0.0078125, %v2055_v23 }
 0xcb0   : > { %v2057_v25 = vadd.f32 1e-12, %v2056_v24 }
 0xcb2   : > { %2762 = vrsqrt.f32 %v2057_v25 }
 0xcbf   : > { %v2763_v26 = vpop.eup %2762 }
 0xcc0   : > { %v2059_v29 = vmul.f32 %v2763_v26, %v2052_v21 }
 0xcc2   : > { %v2066_v30 = vmul.f32 %v2409_v27, %v2059_v29  ;;  %2078 = sbr.rel (%p2411_p7) target bundleno = 3272 (0xcc8), region = 104 }
 0xcc4   : > { %v2073_v31 = vadd.f32 %v2410_v28, %v2066_v30 }
 0xcc6   : > { %2074 = vst [vmem:[#allocation2] sm:$0xff] %v2073_v31 }
 0xcc7   : > { %2079 = vst [vmem:[%s3224_s28] sm:$0xff] %v2073_v31 }
 0xcc8 PF: > { %s3564_s19 = sld [smem:[#allocation14_spill]] }
 0xcc9   : > { %s3565_s21 = sld [smem:[#allocation10_spill]] }
 0xcca   : > { %s3566_s22 = sld [smem:[#allocation11_spill]] }
 0xccb   : > { %s3567_s23 = sld [smem:[#allocation17_spill]] }
 0xccc   : > { %s3568_s24 = sld [smem:[#allocation12_spill]] }
 0xccd   : > { %s3569_s25 = sld [smem:[#allocation13_spill]] }
 0xcce   : > { %s32_s28 = sadd.s32 1, %s3564_s19   ;;  %s3570_s26 = sld [smem:[#allocation15_spill]] }
 0xccf   : > { %p29_p1 = scmp.ge.s32.totalorder %s32_s28, 6   ;;  %s3571_s27 = sld [smem:[#allocation16_spill]] }
 0xcd1   :  { %31 = sbr.rel (!%p29_p1) target bundleno = 24 (0x18), region = 189 }
 0xcd6   :  { %2099 = vsyncpa [#allocation4], 1 }
 0xcd7   :  { %2101 = vsyncpa [#allocation4 + $0x1], 1 }
 0xcd8   :  { %2102 = vsyncpa [#allocation6], 1 }
 0xcd9   :  { %2104 = vsyncpa [#allocation6 + $0x1], 1 }

</bundles_post_ra>
